<compile_context>
chip_gen: v7x
topology: tpu7x:2x2x1
jax: 0.10.0
libtpu: 0.0.40
codegen_flags: <defaults>
</compile_context>

<pallas_src>
import jax
import jax.numpy as jnp
from jax.experimental import pallas as pl
from jax.experimental.pallas import tpu as pltpu


# ----------------------------------------------------------------------------
# Fused Pallas kernel: 2x LSTM (layer-outer / time-inner) + linear + sigmoid
# ----------------------------------------------------------------------------
def _make_fused_kernel(n_layers, T, H):
    """Build the kernel, closing over static layer count / sequence length."""

    def kernel(*refs):
        x_ref = refs[0]                               # (T, TB, E) time-major embedded seq
        layer_refs = refs[1:1 + 3 * n_layers]         # per layer: wih_t, whh_t, bias
        wout_ref = refs[1 + 3 * n_layers]             # (H, O_pad)
        bout_ref = refs[2 + 3 * n_layers]             # (1, O_pad)
        o_ref = refs[3 + 3 * n_layers]                # (TB, O_pad)
        gx_ref = refs[4 + 3 * n_layers]               # scratch (T, TB, 4H) f32
        hseq_ref = refs[5 + 3 * n_layers]             # scratch (T, TB, H)  f32

        TB = x_ref.shape[1]                           # batch tile (multiple of 8)
        E = x_ref.shape[2]

        # Lane mask for the 'g' gate region [2H, 3H) of the fused 4H axis.
        # Hoisted out of all loops (JAX does not CSE broadcasts).
        lane = jax.lax.broadcasted_iota(jnp.int32, (TB, 4 * H), dimension=1)
        is_g = (lane >= 2 * H) & (lane < 3 * H)

        h_last = None
        for l in range(n_layers):
            wih = layer_refs[3 * l][...]              # (Din, 4H)  (i/f/o cols pre-scaled x0.5)
            whh = layer_refs[3 * l + 1][...]          # (H, 4H)    (i/f/o cols pre-scaled x0.5)
            bias = layer_refs[3 * l + 2][...]         # (1, 4H) f32 (i/f/o pre-scaled x0.5)

            # ---- Input projection hoisted out of the recurrence ------------
            # One batched MXU matmul over all T steps (M = T*TB), bias folded in.
            if l == 0:
                inp2d = x_ref[...].reshape(T * TB, E)
            else:
                inp2d = hseq_ref[...].reshape(T * TB, H)
            gx = jnp.dot(inp2d.astype(wih.dtype), wih,
                         preferred_element_type=jnp.float32) + bias
            gx_ref[...] = gx.reshape(T, TB, 4 * H)    # time-major scratch

            # ---- Serial recurrence: only h @ W_hh^T per step ---------------
            h = jnp.zeros((TB, H), jnp.float32)
            c = jnp.zeros((TB, H), jnp.float32)
            for t in range(T):                        # T is small & static: full unroll
                gates = gx_ref[t] + jnp.dot(h.astype(whh.dtype), whh,
                                            preferred_element_type=jnp.float32)
                # Single full-vreg tanh; sigmoid(x) = 0.5*(tanh(x/2)+1) with the
                # x/2 already folded into the i/f/o weight columns on the host.
                th = jnp.tanh(gates)
                act = jnp.where(is_g, th, 0.5 * th + 0.5)
                i_g = act[:, 0 * H:1 * H]
                f_g = act[:, 1 * H:2 * H]
                g_g = act[:, 2 * H:3 * H]
                o_g = act[:, 3 * H:4 * H]
                c = f_g * c + i_g * g_g
                h = o_g * jnp.tanh(c)
                if l < n_layers - 1:
                    hseq_ref[t] = h                   # leading-axis dense store
            h_last = h

        # Output head on the last layer's final hidden state (128-lane dense).
        o_ref[...] = jax.nn.sigmoid(
            jnp.dot(h_last.astype(wout_ref.dtype), wout_ref[...],
                    preferred_element_type=jnp.float32)
            + bout_ref[...]
        ).astype(o_ref.dtype)

    return kernel


def fused_lstm_forward(x_tbe, lstm_params, w_out_p, b_out_p, *, tile_b=8):
    """x_tbe: (T, B_pad, E) f32 time-major.  Returns sigmoid head: (B_pad, O_pad)."""
    T, B_pad, E = x_tbe.shape
    H = lstm_params[0]["w_hh_t"].shape[0]
    O_pad = w_out_p.shape[1]
    n_layers = len(lstm_params)

    TILE_B = min(tile_b, B_pad)
    assert B_pad % TILE_B == 0 and TILE_B % 8 == 0

    inputs = [x_tbe]
    in_specs = [pl.BlockSpec((T, TILE_B, E), lambda b: (0, b, 0))]
    for layer in lstm_params:
        din = layer["w_ih_t"].shape[0]
        inputs += [layer["w_ih_t"], layer["w_hh_t"], layer["bias"]]
        in_specs += [
            pl.BlockSpec((din, 4 * H), lambda b: (0, 0)),
            pl.BlockSpec((H, 4 * H), lambda b: (0, 0)),
            pl.BlockSpec((1, 4 * H), lambda b: (0, 0)),
        ]
    inputs += [w_out_p, b_out_p]
    in_specs += [
        pl.BlockSpec((H, O_pad), lambda b: (0, 0)),
        pl.BlockSpec((1, O_pad), lambda b: (0, 0)),
    ]

    kernel = _make_fused_kernel(n_layers, T, H)

    return pl.pallas_call(
        kernel,
        out_shape=jax.ShapeDtypeStruct((B_pad, O_pad), jnp.float32),
        grid_spec=pltpu.PrefetchScalarGridSpec(
            num_scalar_prefetch=0,
            grid=(B_pad // TILE_B,),                  # batch-tile axis; "parallel" so
            in_specs=in_specs,                        # v7x can shard across both TCs
            out_specs=pl.BlockSpec((TILE_B, O_pad), lambda b: (b, 0)),
            scratch_shapes=[
                pltpu.VMEM((T, TILE_B, 4 * H), jnp.float32),   # gates_x (time-major)
                pltpu.VMEM((T, TILE_B, H), jnp.float32),       # per-layer hidden seq
            ],
        ),
        compiler_params=pltpu.CompilerParams(
            dimension_semantics=("parallel",),
        ),
    )(*inputs)


# ----------------------------------------------------------------------------
# Host-side parameter preparation (one-time, NOT per forward call)
# ----------------------------------------------------------------------------
def prepare_kernel_params(params, *, compute_dtype=jnp.float32, out_pad=128):
    """Fold the sigmoid-via-tanh /2 into i/f/o weight columns, pad the output
    head to 128 lanes, and optionally cast matmul weights to bf16 (v6e/v7x)."""
    H = params["lstm"][0]["w_hh_t"].shape[0]
    O = params["w_out_t"].shape[1]
    assert out_pad >= O

    # Gate order i, f, g, o — scale sigmoid gates by 0.5 (exact power-of-two).
    gate_scale = jnp.concatenate([
        jnp.full((2 * H,), 0.5, jnp.float32),    # i, f
        jnp.ones((H,), jnp.float32),             # g (tanh, untouched)
        jnp.full((H,), 0.5, jnp.float32),        # o
    ])

    lstm_k = []
    for layer in params["lstm"]:
        lstm_k.append({
            "w_ih_t": (layer["w_ih_t"] * gate_scale[None, :]).astype(compute_dtype),
            "w_hh_t": (layer["w_hh_t"] * gate_scale[None, :]).astype(compute_dtype),
            "bias": (layer["bias"] * gate_scale).reshape(1, 4 * H).astype(jnp.float32),
        })

    w_out_p = jnp.zeros((H, out_pad), compute_dtype).at[:, :O].set(
        params["w_out_t"].astype(compute_dtype))
    b_out_p = jnp.zeros((1, out_pad), jnp.float32).at[0, :O].set(params["b_out"])

    return {"embedding": params["embedding"], "lstm": lstm_k,
            "w_out_t": w_out_p, "b_out": b_out_p, "out_dim": O}


def model_forward(X, kparams):
    """X: (B, T) int32 token ids. Returns sigmoid logits, shape (B, output_dim)."""
    B = X.shape[0]
    O = kparams["out_dim"]
    # Embedding row gather stays as a single XLA op (glue).
    emb = jnp.take(kparams["embedding"], X, axis=0).astype(jnp.float32)   # (B, T, E)
    # Pad batch to a multiple of 8 sublanes — padded rows are free per step.
    B_pad = ((B + 7) // 8) * 8
    if B_pad != B:
        emb = jnp.pad(emb, ((0, B_pad - B), (0, 0), (0, 0)))
    # Time-major so all per-step kernel reads are contiguous leading-axis slices.
    x_tbe = jnp.transpose(emb, (1, 0, 2))                                 # (T, B_pad, E)
    out_pad = fused_lstm_forward(x_tbe, kparams["lstm"],
                                 kparams["w_out_t"], kparams["b_out"])
    # Drop batch/lane padding; match the PyTorch module's trailing .squeeze().
    return jnp.squeeze(out_pad[:B, :O])


# ----------------------------------------------------------------------------
# Pure-JAX reference (uses the RAW, un-scaled, un-padded parameters)
# ----------------------------------------------------------------------------
def _lstm_ref(x_tbd, w_ih_t, w_hh_t, bias):
    T, B, _ = x_tbd.shape
    H = w_hh_t.shape[0]

    def step(carry, xt):
        h, c = carry
        gates = xt @ w_ih_t + h @ w_hh_t + bias
        i = jax.nn.sigmoid(gates[:, :H])
        f = jax.nn.sigmoid(gates[:, H:2 * H])
        g = jnp.tanh(gates[:, 2 * H:3 * H])
        o = jax.nn.sigmoid(gates[:, 3 * H:4 * H])
        c = f * c + i * g
        h = o * jnp.tanh(c)
        return (h, c), h

    (_, _), ys = jax.lax.scan(
        step, (jnp.zeros((B, H), jnp.float32), jnp.zeros((B, H), jnp.float32)), x_tbd
    )
    return ys


def model_ref(X, params):
    emb = jnp.take(params["embedding"], X, axis=0)
    x = jnp.transpose(emb, (1, 0, 2)).astype(jnp.float32)
    for layer in params["lstm"]:
        x = _lstm_ref(x, layer["w_ih_t"], layer["w_hh_t"], layer["bias"])
    h_last = x[-1]
    out = jax.nn.sigmoid(h_last @ params["w_out_t"] + params["b_out"][None, :])
    return jnp.squeeze(out)


# ----------------------------------------------------------------------------
# Main
# ----------------------------------------------------------------------------
if __name__ == "__main__":
    # Small shapes consistent with the module's forward.
    NB_WORDS = 100
    EMB = 32
    HIDDEN = 32
    OUT_DIM = 2
    N_LAYERS = 2
    B, T = 2, 8

    key = jax.random.PRNGKey(0)
    keys = jax.random.split(key, 4 + 4 * N_LAYERS)

    initrange = 0.1
    stdv = 1.0 / jnp.sqrt(HIDDEN)

    # Embedding: uniform(-0.1, 0.1)  (init_weights overwrites the padding row too)
    embedding = jax.random.uniform(keys[0], (NB_WORDS, EMB), jnp.float32,
                                   -initrange, initrange)

    lstm_params = []
    for l in range(N_LAYERS):
        din = EMB if l == 0 else HIDDEN
        kw = keys[4 + 4 * l: 4 + 4 * (l + 1)]
        w_ih = jax.random.uniform(kw[0], (4 * HIDDEN, din), jnp.float32, -stdv, stdv)
        w_hh = jax.random.uniform(kw[1], (4 * HIDDEN, HIDDEN), jnp.float32, -stdv, stdv)
        b_ih = jax.random.uniform(kw[2], (4 * HIDDEN,), jnp.float32, -stdv, stdv)
        b_hh = jax.random.uniform(kw[3], (4 * HIDDEN,), jnp.float32, -stdv, stdv)
        lstm_params.append({
            "w_ih_t": w_ih.T,              # (din, 4H)
            "w_hh_t": w_hh.T,              # (H, 4H)
            "bias": b_ih + b_hh,           # (4H,)
        })

    # Output layer: weight uniform(-0.1, 0.1), bias = 0
    w_out = jax.random.uniform(keys[1], (OUT_DIM, HIDDEN), jnp.float32,
                               -initrange, initrange)
    b_out = jnp.zeros((OUT_DIM,), jnp.float32)

    params = {
        "embedding": embedding,
        "lstm": lstm_params,
        "w_out_t": w_out.T,                # (H, OUT_DIM)
        "b_out": b_out,
    }

    # Token ids (index 0 is the padding index but is still a valid lookup).
    X = jax.random.randint(keys[2], (B, T), 0, NB_WORDS, dtype=jnp.int32)

    ref = jax.block_until_ready(model_ref(X, params))

    # f32 path (exactness check; sigmoid-via-tanh rewrite is mathematically exact).
    kparams_f32 = prepare_kernel_params(params, compute_dtype=jnp.float32)
    out_f32 = jax.block_until_ready(model_forward(X, kparams_f32))
    assert out_f32.shape == (B, OUT_DIM), out_f32.shape
    assert jnp.allclose(out_f32, ref, atol=2e-5, rtol=1e-5), (out_f32, ref)

    # bf16-weight / f32-accumulate path (v6e/v7x MXU fast path); looser tolerance
    # purely for bf16 weight/activation quantization of matmul inputs.
    kparams_bf16 = prepare_kernel_params(params, compute_dtype=jnp.bfloat16)
    out_bf16 = jax.block_until_ready(model_forward(X, kparams_bf16))
    assert out_bf16.shape == (B, OUT_DIM), out_bf16.shape
    assert jnp.allclose(out_bf16, ref, atol=5e-2, rtol=0), (out_bf16, ref)

    print("KERNEL_OK")
</pallas_src>

<mosaic_0001>
module attributes {stable_mosaic.version = 11 : i64} {
  func.func @kernel(%arg0: i32, %arg1: memref<8x8x32xf32, #tpu.memory_space<vmem>>, %arg2: memref<32x128xf32, #tpu.memory_space<vmem>>, %arg3: memref<32x128xf32, #tpu.memory_space<vmem>>, %arg4: memref<1x128xf32, #tpu.memory_space<vmem>>, %arg5: memref<32x128xf32, #tpu.memory_space<vmem>>, %arg6: memref<32x128xf32, #tpu.memory_space<vmem>>, %arg7: memref<1x128xf32, #tpu.memory_space<vmem>>, %arg8: memref<32x128xf32, #tpu.memory_space<vmem>>, %arg9: memref<1x128xf32, #tpu.memory_space<vmem>>, %arg10: memref<8x128xf32, #tpu.memory_space<vmem>>, %arg11: memref<8x8x128xf32, #tpu.memory_space<vmem>>, %arg12: memref<8x8x32xf32, #tpu.memory_space<vmem>>) attributes {dimension_semantics = [#tpu.dimension_semantics<parallel>], iteration_bounds = array<i64: 1>, scalar_prefetch = 0 : i64, scratch_operands = 2 : i64, tpu.core_type = #tpu.core_type<tc>, window_params = [{transform_indices = @transform_0, window_bounds = array<i64: 8, 8, 32>}, {pipeline_mode = #tpu.pipeline_mode<synchronous>, transform_indices = @transform_1, window_bounds = array<i64: 32, 128>}, {pipeline_mode = #tpu.pipeline_mode<synchronous>, transform_indices = @transform_2, window_bounds = array<i64: 32, 128>}, {pipeline_mode = #tpu.pipeline_mode<synchronous>, transform_indices = @transform_3, window_bounds = array<i64: 1, 128>}, {pipeline_mode = #tpu.pipeline_mode<synchronous>, transform_indices = @transform_4, window_bounds = array<i64: 32, 128>}, {pipeline_mode = #tpu.pipeline_mode<synchronous>, transform_indices = @transform_5, window_bounds = array<i64: 32, 128>}, {pipeline_mode = #tpu.pipeline_mode<synchronous>, transform_indices = @transform_6, window_bounds = array<i64: 1, 128>}, {pipeline_mode = #tpu.pipeline_mode<synchronous>, transform_indices = @transform_7, window_bounds = array<i64: 32, 128>}, {pipeline_mode = #tpu.pipeline_mode<synchronous>, transform_indices = @transform_8, window_bounds = array<i64: 1, 128>}, {transform_indices = @transform_9, window_bounds = array<i64: 8, 128>}]} {
    %0 = tpu.iota {dimensions = array<i32: 1>} : vector<8x128xi32>
    %c64_i32 = arith.constant 64 : i32
    %1 = vector.broadcast %c64_i32 : i32 to vector<8x128xi32>
    %2 = arith.cmpi sge, %0, %1 : vector<8x128xi32>
    %c96_i32 = arith.constant 96 : i32
    %3 = vector.broadcast %c96_i32 : i32 to vector<8x128xi32>
    %4 = arith.cmpi slt, %0, %3 : vector<8x128xi32>
    %5 = arith.andi %2, %4 : vector<8x128xi1>
    %c0 = arith.constant 0 : index
    %c0_0 = arith.constant 0 : index
    %6 = vector.load %arg2[%c0, %c0_0] : memref<32x128xf32, #tpu.memory_space<vmem>>, vector<32x128xf32>
    %c0_1 = arith.constant 0 : index
    %c0_2 = arith.constant 0 : index
    %7 = vector.load %arg3[%c0_1, %c0_2] : memref<32x128xf32, #tpu.memory_space<vmem>>, vector<32x128xf32>
    %c0_3 = arith.constant 0 : index
    %c0_4 = arith.constant 0 : index
    %8 = vector.load %arg4[%c0_3, %c0_4] : memref<1x128xf32, #tpu.memory_space<vmem>>, vector<1x128xf32>
    %c0_5 = arith.constant 0 : index
    %c0_6 = arith.constant 0 : index
    %c0_7 = arith.constant 0 : index
    %9 = vector.load %arg1[%c0_5, %c0_6, %c0_7] : memref<8x8x32xf32, #tpu.memory_space<vmem>>, vector<8x8x32xf32>
    %10 = vector.shape_cast %9 : vector<8x8x32xf32> to vector<64x32xf32>
    %cst = arith.constant dense<0.000000e+00> : vector<64x128xf32>
    %11 = tpu.matmul %10, %6, %cst {dimension_numbers = #tpu.dot_dimension_numbers<[1], [0], [0], [1], [0, 0, 1, 1], [], []>} : vector<64x32xf32>, vector<32x128xf32>, vector<64x128xf32> -> vector<64x128xf32>
    %12 = vector.broadcast %8 : vector<1x128xf32> to vector<64x128xf32>
    %13 = arith.addf %11, %12 : vector<64x128xf32>
    %14 = vector.shape_cast %13 : vector<64x128xf32> to vector<8x8x128xf32>
    %c0_8 = arith.constant 0 : index
    %c0_9 = arith.constant 0 : index
    %c0_10 = arith.constant 0 : index
    %15 = vector.load %arg11[%c0_8, %c0_9, %c0_10] : memref<8x8x128xf32, #tpu.memory_space<vmem>>, vector<8x8x128xf32>
    tpu.vector_store %arg11[%c0_8, %c0_9, %c0_10], %14 {strides = array<i32>} : memref<8x8x128xf32, #tpu.memory_space<vmem>>, vector<8x8x128xf32>,
    %cst_11 = arith.constant 0.000000e+00 : f32
    %16 = vector.broadcast %cst_11 : f32 to vector<8x32xf32>
    %cst_12 = arith.constant 0.000000e+00 : f32
    %17 = vector.broadcast %cst_12 : f32 to vector<8x32xf32>
    %c0_13 = arith.constant 0 : index
    %c0_14 = arith.constant 0 : index
    %c0_15 = arith.constant 0 : index
    %18 = vector.load %arg11[%c0_13, %c0_14, %c0_15] : memref<8x8x128xf32, #tpu.memory_space<vmem>>, vector<1x8x128xf32>
    %19 = vector.shape_cast %18 : vector<1x8x128xf32> to vector<8x128xf32>
    %cst_16 = arith.constant dense<0.000000e+00> : vector<8x128xf32>
    %20 = tpu.matmul %16, %7, %cst_16 {dimension_numbers = #tpu.dot_dimension_numbers<[1], [0], [0], [1], [0, 0, 1, 1], [], []>} : vector<8x32xf32>, vector<32x128xf32>, vector<8x128xf32> -> vector<8x128xf32>
    %21 = arith.addf %19, %20 : vector<8x128xf32>
    %22 = math.tanh %21 : vector<8x128xf32>
    %cst_17 = arith.constant 5.000000e-01 : f32
    %23 = vector.broadcast %cst_17 : f32 to vector<8x128xf32>
    %24 = arith.mulf %23, %22 : vector<8x128xf32>
    %cst_18 = arith.constant 5.000000e-01 : f32
    %25 = vector.broadcast %cst_18 : f32 to vector<8x128xf32>
    %26 = arith.addf %24, %25 : vector<8x128xf32>
    %27 = arith.select %5, %22, %26 : vector<8x128xi1>, vector<8x128xf32>
    %28 = vector.extract_strided_slice %27 {offsets = [0, 0], sizes = [8, 32], strides = [1, 1]} : vector<8x128xf32> to vector<8x32xf32>
    %29 = vector.extract_strided_slice %27 {offsets = [0, 32], sizes = [8, 32], strides = [1, 1]} : vector<8x128xf32> to vector<8x32xf32>
    %30 = vector.extract_strided_slice %27 {offsets = [0, 64], sizes = [8, 32], strides = [1, 1]} : vector<8x128xf32> to vector<8x32xf32>
    %31 = vector.extract_strided_slice %27 {offsets = [0, 96], sizes = [8, 32], strides = [1, 1]} : vector<8x128xf32> to vector<8x32xf32>
    %32 = arith.mulf %29, %17 : vector<8x32xf32>
    %33 = arith.mulf %28, %30 : vector<8x32xf32>
    %34 = arith.addf %32, %33 : vector<8x32xf32>
    %35 = math.tanh %34 : vector<8x32xf32>
    %36 = arith.mulf %31, %35 : vector<8x32xf32>
    %c0_19 = arith.constant 0 : index
    %c0_20 = arith.constant 0 : index
    %c0_21 = arith.constant 0 : index
    %37 = vector.load %arg12[%c0_19, %c0_20, %c0_21] : memref<8x8x32xf32, #tpu.memory_space<vmem>>, vector<1x8x32xf32>
    %38 = vector.shape_cast %37 : vector<1x8x32xf32> to vector<8x32xf32>
    %39 = vector.shape_cast %36 : vector<8x32xf32> to vector<1x8x32xf32>
    tpu.vector_store %arg12[%c0_19, %c0_20, %c0_21], %39 {strides = array<i32>} : memref<8x8x32xf32, #tpu.memory_space<vmem>>, vector<1x8x32xf32>,
    %c1 = arith.constant 1 : index
    %c0_22 = arith.constant 0 : index
    %c0_23 = arith.constant 0 : index
    %40 = vector.load %arg11[%c1, %c0_22, %c0_23] : memref<8x8x128xf32, #tpu.memory_space<vmem>>, vector<1x8x128xf32>
    %41 = vector.shape_cast %40 : vector<1x8x128xf32> to vector<8x128xf32>
    %cst_24 = arith.constant dense<0.000000e+00> : vector<8x128xf32>
    %42 = tpu.matmul %36, %7, %cst_24 {dimension_numbers = #tpu.dot_dimension_numbers<[1], [0], [0], [1], [0, 0, 1, 1], [], []>} : vector<8x32xf32>, vector<32x128xf32>, vector<8x128xf32> -> vector<8x128xf32>
    %43 = arith.addf %41, %42 : vector<8x128xf32>
    %44 = math.tanh %43 : vector<8x128xf32>
    %cst_25 = arith.constant 5.000000e-01 : f32
    %45 = vector.broadcast %cst_25 : f32 to vector<8x128xf32>
    %46 = arith.mulf %45, %44 : vector<8x128xf32>
    %cst_26 = arith.constant 5.000000e-01 : f32
    %47 = vector.broadcast %cst_26 : f32 to vector<8x128xf32>
    %48 = arith.addf %46, %47 : vector<8x128xf32>
    %49 = arith.select %5, %44, %48 : vector<8x128xi1>, vector<8x128xf32>
    %50 = vector.extract_strided_slice %49 {offsets = [0, 0], sizes = [8, 32], strides = [1, 1]} : vector<8x128xf32> to vector<8x32xf32>
    %51 = vector.extract_strided_slice %49 {offsets = [0, 32], sizes = [8, 32], strides = [1, 1]} : vector<8x128xf32> to vector<8x32xf32>
    %52 = vector.extract_strided_slice %49 {offsets = [0, 64], sizes = [8, 32], strides = [1, 1]} : vector<8x128xf32> to vector<8x32xf32>
    %53 = vector.extract_strided_slice %49 {offsets = [0, 96], sizes = [8, 32], strides = [1, 1]} : vector<8x128xf32> to vector<8x32xf32>
    %54 = arith.mulf %51, %34 : vector<8x32xf32>
    %55 = arith.mulf %50, %52 : vector<8x32xf32>
    %56 = arith.addf %54, %55 : vector<8x32xf32>
    %57 = math.tanh %56 : vector<8x32xf32>
    %58 = arith.mulf %53, %57 : vector<8x32xf32>
    %c1_27 = arith.constant 1 : index
    %c0_28 = arith.constant 0 : index
    %c0_29 = arith.constant 0 : index
    %59 = vector.load %arg12[%c1_27, %c0_28, %c0_29] : memref<8x8x32xf32, #tpu.memory_space<vmem>>, vector<1x8x32xf32>
    %60 = vector.shape_cast %59 : vector<1x8x32xf32> to vector<8x32xf32>
    %61 = vector.shape_cast %58 : vector<8x32xf32> to vector<1x8x32xf32>
    tpu.vector_store %arg12[%c1_27, %c0_28, %c0_29], %61 {strides = array<i32>} : memref<8x8x32xf32, #tpu.memory_space<vmem>>, vector<1x8x32xf32>,
    %c2 = arith.constant 2 : index
    %c0_30 = arith.constant 0 : index
    %c0_31 = arith.constant 0 : index
    %62 = vector.load %arg11[%c2, %c0_30, %c0_31] : memref<8x8x128xf32, #tpu.memory_space<vmem>>, vector<1x8x128xf32>
    %63 = vector.shape_cast %62 : vector<1x8x128xf32> to vector<8x128xf32>
    %cst_32 = arith.constant dense<0.000000e+00> : vector<8x128xf32>
    %64 = tpu.matmul %58, %7, %cst_32 {dimension_numbers = #tpu.dot_dimension_numbers<[1], [0], [0], [1], [0, 0, 1, 1], [], []>} : vector<8x32xf32>, vector<32x128xf32>, vector<8x128xf32> -> vector<8x128xf32>
    %65 = arith.addf %63, %64 : vector<8x128xf32>
    %66 = math.tanh %65 : vector<8x128xf32>
    %cst_33 = arith.constant 5.000000e-01 : f32
    %67 = vector.broadcast %cst_33 : f32 to vector<8x128xf32>
    %68 = arith.mulf %67, %66 : vector<8x128xf32>
    %cst_34 = arith.constant 5.000000e-01 : f32
    %69 = vector.broadcast %cst_34 : f32 to vector<8x128xf32>
    %70 = arith.addf %68, %69 : vector<8x128xf32>
    %71 = arith.select %5, %66, %70 : vector<8x128xi1>, vector<8x128xf32>
    %72 = vector.extract_strided_slice %71 {offsets = [0, 0], sizes = [8, 32], strides = [1, 1]} : vector<8x128xf32> to vector<8x32xf32>
    %73 = vector.extract_strided_slice %71 {offsets = [0, 32], sizes = [8, 32], strides = [1, 1]} : vector<8x128xf32> to vector<8x32xf32>
    %74 = vector.extract_strided_slice %71 {offsets = [0, 64], sizes = [8, 32], strides = [1, 1]} : vector<8x128xf32> to vector<8x32xf32>
    %75 = vector.extract_strided_slice %71 {offsets = [0, 96], sizes = [8, 32], strides = [1, 1]} : vector<8x128xf32> to vector<8x32xf32>
    %76 = arith.mulf %73, %56 : vector<8x32xf32>
    %77 = arith.mulf %72, %74 : vector<8x32xf32>
    %78 = arith.addf %76, %77 : vector<8x32xf32>
    %79 = math.tanh %78 : vector<8x32xf32>
    %80 = arith.mulf %75, %79 : vector<8x32xf32>
    %c2_35 = arith.constant 2 : index
    %c0_36 = arith.constant 0 : index
    %c0_37 = arith.constant 0 : index
    %81 = vector.load %arg12[%c2_35, %c0_36, %c0_37] : memref<8x8x32xf32, #tpu.memory_space<vmem>>, vector<1x8x32xf32>
    %82 = vector.shape_cast %81 : vector<1x8x32xf32> to vector<8x32xf32>
    %83 = vector.shape_cast %80 : vector<8x32xf32> to vector<1x8x32xf32>
    tpu.vector_store %arg12[%c2_35, %c0_36, %c0_37], %83 {strides = array<i32>} : memref<8x8x32xf32, #tpu.memory_space<vmem>>, vector<1x8x32xf32>,
    %c3 = arith.constant 3 : index
    %c0_38 = arith.constant 0 : index
    %c0_39 = arith.constant 0 : index
    %84 = vector.load %arg11[%c3, %c0_38, %c0_39] : memref<8x8x128xf32, #tpu.memory_space<vmem>>, vector<1x8x128xf32>
    %85 = vector.shape_cast %84 : vector<1x8x128xf32> to vector<8x128xf32>
    %cst_40 = arith.constant dense<0.000000e+00> : vector<8x128xf32>
    %86 = tpu.matmul %80, %7, %cst_40 {dimension_numbers = #tpu.dot_dimension_numbers<[1], [0], [0], [1], [0, 0, 1, 1], [], []>} : vector<8x32xf32>, vector<32x128xf32>, vector<8x128xf32> -> vector<8x128xf32>
    %87 = arith.addf %85, %86 : vector<8x128xf32>
    %88 = math.tanh %87 : vector<8x128xf32>
    %cst_41 = arith.constant 5.000000e-01 : f32
    %89 = vector.broadcast %cst_41 : f32 to vector<8x128xf32>
    %90 = arith.mulf %89, %88 : vector<8x128xf32>
    %cst_42 = arith.constant 5.000000e-01 : f32
    %91 = vector.broadcast %cst_42 : f32 to vector<8x128xf32>
    %92 = arith.addf %90, %91 : vector<8x128xf32>
    %93 = arith.select %5, %88, %92 : vector<8x128xi1>, vector<8x128xf32>
    %94 = vector.extract_strided_slice %93 {offsets = [0, 0], sizes = [8, 32], strides = [1, 1]} : vector<8x128xf32> to vector<8x32xf32>
    %95 = vector.extract_strided_slice %93 {offsets = [0, 32], sizes = [8, 32], strides = [1, 1]} : vector<8x128xf32> to vector<8x32xf32>
    %96 = vector.extract_strided_slice %93 {offsets = [0, 64], sizes = [8, 32], strides = [1, 1]} : vector<8x128xf32> to vector<8x32xf32>
    %97 = vector.extract_strided_slice %93 {offsets = [0, 96], sizes = [8, 32], strides = [1, 1]} : vector<8x128xf32> to vector<8x32xf32>
    %98 = arith.mulf %95, %78 : vector<8x32xf32>
    %99 = arith.mulf %94, %96 : vector<8x32xf32>
    %100 = arith.addf %98, %99 : vector<8x32xf32>
    %101 = math.tanh %100 : vector<8x32xf32>
    %102 = arith.mulf %97, %101 : vector<8x32xf32>
    %c3_43 = arith.constant 3 : index
    %c0_44 = arith.constant 0 : index
    %c0_45 = arith.constant 0 : index
    %103 = vector.load %arg12[%c3_43, %c0_44, %c0_45] : memref<8x8x32xf32, #tpu.memory_space<vmem>>, vector<1x8x32xf32>
    %104 = vector.shape_cast %103 : vector<1x8x32xf32> to vector<8x32xf32>
    %105 = vector.shape_cast %102 : vector<8x32xf32> to vector<1x8x32xf32>
    tpu.vector_store %arg12[%c3_43, %c0_44, %c0_45], %105 {strides = array<i32>} : memref<8x8x32xf32, #tpu.memory_space<vmem>>, vector<1x8x32xf32>,
    %c4 = arith.constant 4 : index
    %c0_46 = arith.constant 0 : index
    %c0_47 = arith.constant 0 : index
    %106 = vector.load %arg11[%c4, %c0_46, %c0_47] : memref<8x8x128xf32, #tpu.memory_space<vmem>>, vector<1x8x128xf32>
    %107 = vector.shape_cast %106 : vector<1x8x128xf32> to vector<8x128xf32>
    %cst_48 = arith.constant dense<0.000000e+00> : vector<8x128xf32>
    %108 = tpu.matmul %102, %7, %cst_48 {dimension_numbers = #tpu.dot_dimension_numbers<[1], [0], [0], [1], [0, 0, 1, 1], [], []>} : vector<8x32xf32>, vector<32x128xf32>, vector<8x128xf32> -> vector<8x128xf32>
    %109 = arith.addf %107, %108 : vector<8x128xf32>
    %110 = math.tanh %109 : vector<8x128xf32>
    %cst_49 = arith.constant 5.000000e-01 : f32
    %111 = vector.broadcast %cst_49 : f32 to vector<8x128xf32>
    %112 = arith.mulf %111, %110 : vector<8x128xf32>
    %cst_50 = arith.constant 5.000000e-01 : f32
    %113 = vector.broadcast %cst_50 : f32 to vector<8x128xf32>
    %114 = arith.addf %112, %113 : vector<8x128xf32>
    %115 = arith.select %5, %110, %114 : vector<8x128xi1>, vector<8x128xf32>
    %116 = vector.extract_strided_slice %115 {offsets = [0, 0], sizes = [8, 32], strides = [1, 1]} : vector<8x128xf32> to vector<8x32xf32>
    %117 = vector.extract_strided_slice %115 {offsets = [0, 32], sizes = [8, 32], strides = [1, 1]} : vector<8x128xf32> to vector<8x32xf32>
    %118 = vector.extract_strided_slice %115 {offsets = [0, 64], sizes = [8, 32], strides = [1, 1]} : vector<8x128xf32> to vector<8x32xf32>
    %119 = vector.extract_strided_slice %115 {offsets = [0, 96], sizes = [8, 32], strides = [1, 1]} : vector<8x128xf32> to vector<8x32xf32>
    %120 = arith.mulf %117, %100 : vector<8x32xf32>
    %121 = arith.mulf %116, %118 : vector<8x32xf32>
    %122 = arith.addf %120, %121 : vector<8x32xf32>
    %123 = math.tanh %122 : vector<8x32xf32>
    %124 = arith.mulf %119, %123 : vector<8x32xf32>
    %c4_51 = arith.constant 4 : index
    %c0_52 = arith.constant 0 : index
    %c0_53 = arith.constant 0 : index
    %125 = vector.load %arg12[%c4_51, %c0_52, %c0_53] : memref<8x8x32xf32, #tpu.memory_space<vmem>>, vector<1x8x32xf32>
    %126 = vector.shape_cast %125 : vector<1x8x32xf32> to vector<8x32xf32>
    %127 = vector.shape_cast %124 : vector<8x32xf32> to vector<1x8x32xf32>
    tpu.vector_store %arg12[%c4_51, %c0_52, %c0_53], %127 {strides = array<i32>} : memref<8x8x32xf32, #tpu.memory_space<vmem>>, vector<1x8x32xf32>,
    %c5 = arith.constant 5 : index
    %c0_54 = arith.constant 0 : index
    %c0_55 = arith.constant 0 : index
    %128 = vector.load %arg11[%c5, %c0_54, %c0_55] : memref<8x8x128xf32, #tpu.memory_space<vmem>>, vector<1x8x128xf32>
    %129 = vector.shape_cast %128 : vector<1x8x128xf32> to vector<8x128xf32>
    %cst_56 = arith.constant dense<0.000000e+00> : vector<8x128xf32>
    %130 = tpu.matmul %124, %7, %cst_56 {dimension_numbers = #tpu.dot_dimension_numbers<[1], [0], [0], [1], [0, 0, 1, 1], [], []>} : vector<8x32xf32>, vector<32x128xf32>, vector<8x128xf32> -> vector<8x128xf32>
    %131 = arith.addf %129, %130 : vector<8x128xf32>
    %132 = math.tanh %131 : vector<8x128xf32>
    %cst_57 = arith.constant 5.000000e-01 : f32
    %133 = vector.broadcast %cst_57 : f32 to vector<8x128xf32>
    %134 = arith.mulf %133, %132 : vector<8x128xf32>
    %cst_58 = arith.constant 5.000000e-01 : f32
    %135 = vector.broadcast %cst_58 : f32 to vector<8x128xf32>
    %136 = arith.addf %134, %135 : vector<8x128xf32>
    %137 = arith.select %5, %132, %136 : vector<8x128xi1>, vector<8x128xf32>
    %138 = vector.extract_strided_slice %137 {offsets = [0, 0], sizes = [8, 32], strides = [1, 1]} : vector<8x128xf32> to vector<8x32xf32>
    %139 = vector.extract_strided_slice %137 {offsets = [0, 32], sizes = [8, 32], strides = [1, 1]} : vector<8x128xf32> to vector<8x32xf32>
    %140 = vector.extract_strided_slice %137 {offsets = [0, 64], sizes = [8, 32], strides = [1, 1]} : vector<8x128xf32> to vector<8x32xf32>
    %141 = vector.extract_strided_slice %137 {offsets = [0, 96], sizes = [8, 32], strides = [1, 1]} : vector<8x128xf32> to vector<8x32xf32>
    %142 = arith.mulf %139, %122 : vector<8x32xf32>
    %143 = arith.mulf %138, %140 : vector<8x32xf32>
    %144 = arith.addf %142, %143 : vector<8x32xf32>
    %145 = math.tanh %144 : vector<8x32xf32>
    %146 = arith.mulf %141, %145 : vector<8x32xf32>
    %c5_59 = arith.constant 5 : index
    %c0_60 = arith.constant 0 : index
    %c0_61 = arith.constant 0 : index
    %147 = vector.load %arg12[%c5_59, %c0_60, %c0_61] : memref<8x8x32xf32, #tpu.memory_space<vmem>>, vector<1x8x32xf32>
    %148 = vector.shape_cast %147 : vector<1x8x32xf32> to vector<8x32xf32>
    %149 = vector.shape_cast %146 : vector<8x32xf32> to vector<1x8x32xf32>
    tpu.vector_store %arg12[%c5_59, %c0_60, %c0_61], %149 {strides = array<i32>} : memref<8x8x32xf32, #tpu.memory_space<vmem>>, vector<1x8x32xf32>,
    %c6 = arith.constant 6 : index
    %c0_62 = arith.constant 0 : index
    %c0_63 = arith.constant 0 : index
    %150 = vector.load %arg11[%c6, %c0_62, %c0_63] : memref<8x8x128xf32, #tpu.memory_space<vmem>>, vector<1x8x128xf32>
    %151 = vector.shape_cast %150 : vector<1x8x128xf32> to vector<8x128xf32>
    %cst_64 = arith.constant dense<0.000000e+00> : vector<8x128xf32>
    %152 = tpu.matmul %146, %7, %cst_64 {dimension_numbers = #tpu.dot_dimension_numbers<[1], [0], [0], [1], [0, 0, 1, 1], [], []>} : vector<8x32xf32>, vector<32x128xf32>, vector<8x128xf32> -> vector<8x128xf32>
    %153 = arith.addf %151, %152 : vector<8x128xf32>
    %154 = math.tanh %153 : vector<8x128xf32>
    %cst_65 = arith.constant 5.000000e-01 : f32
    %155 = vector.broadcast %cst_65 : f32 to vector<8x128xf32>
    %156 = arith.mulf %155, %154 : vector<8x128xf32>
    %cst_66 = arith.constant 5.000000e-01 : f32
    %157 = vector.broadcast %cst_66 : f32 to vector<8x128xf32>
    %158 = arith.addf %156, %157 : vector<8x128xf32>
    %159 = arith.select %5, %154, %158 : vector<8x128xi1>, vector<8x128xf32>
    %160 = vector.extract_strided_slice %159 {offsets = [0, 0], sizes = [8, 32], strides = [1, 1]} : vector<8x128xf32> to vector<8x32xf32>
    %161 = vector.extract_strided_slice %159 {offsets = [0, 32], sizes = [8, 32], strides = [1, 1]} : vector<8x128xf32> to vector<8x32xf32>
    %162 = vector.extract_strided_slice %159 {offsets = [0, 64], sizes = [8, 32], strides = [1, 1]} : vector<8x128xf32> to vector<8x32xf32>
    %163 = vector.extract_strided_slice %159 {offsets = [0, 96], sizes = [8, 32], strides = [1, 1]} : vector<8x128xf32> to vector<8x32xf32>
    %164 = arith.mulf %161, %144 : vector<8x32xf32>
    %165 = arith.mulf %160, %162 : vector<8x32xf32>
    %166 = arith.addf %164, %165 : vector<8x32xf32>
    %167 = math.tanh %166 : vector<8x32xf32>
    %168 = arith.mulf %163, %167 : vector<8x32xf32>
    %c6_67 = arith.constant 6 : index
    %c0_68 = arith.constant 0 : index
    %c0_69 = arith.constant 0 : index
    %169 = vector.load %arg12[%c6_67, %c0_68, %c0_69] : memref<8x8x32xf32, #tpu.memory_space<vmem>>, vector<1x8x32xf32>
    %170 = vector.shape_cast %169 : vector<1x8x32xf32> to vector<8x32xf32>
    %171 = vector.shape_cast %168 : vector<8x32xf32> to vector<1x8x32xf32>
    tpu.vector_store %arg12[%c6_67, %c0_68, %c0_69], %171 {strides = array<i32>} : memref<8x8x32xf32, #tpu.memory_space<vmem>>, vector<1x8x32xf32>,
    %c7 = arith.constant 7 : index
    %c0_70 = arith.constant 0 : index
    %c0_71 = arith.constant 0 : index
    %172 = vector.load %arg11[%c7, %c0_70, %c0_71] : memref<8x8x128xf32, #tpu.memory_space<vmem>>, vector<1x8x128xf32>
    %173 = vector.shape_cast %172 : vector<1x8x128xf32> to vector<8x128xf32>
    %cst_72 = arith.constant dense<0.000000e+00> : vector<8x128xf32>
    %174 = tpu.matmul %168, %7, %cst_72 {dimension_numbers = #tpu.dot_dimension_numbers<[1], [0], [0], [1], [0, 0, 1, 1], [], []>} : vector<8x32xf32>, vector<32x128xf32>, vector<8x128xf32> -> vector<8x128xf32>
    %175 = arith.addf %173, %174 : vector<8x128xf32>
    %176 = math.tanh %175 : vector<8x128xf32>
    %cst_73 = arith.constant 5.000000e-01 : f32
    %177 = vector.broadcast %cst_73 : f32 to vector<8x128xf32>
    %178 = arith.mulf %177, %176 : vector<8x128xf32>
    %cst_74 = arith.constant 5.000000e-01 : f32
    %179 = vector.broadcast %cst_74 : f32 to vector<8x128xf32>
    %180 = arith.addf %178, %179 : vector<8x128xf32>
    %181 = arith.select %5, %176, %180 : vector<8x128xi1>, vector<8x128xf32>
    %182 = vector.extract_strided_slice %181 {offsets = [0, 0], sizes = [8, 32], strides = [1, 1]} : vector<8x128xf32> to vector<8x32xf32>
    %183 = vector.extract_strided_slice %181 {offsets = [0, 32], sizes = [8, 32], strides = [1, 1]} : vector<8x128xf32> to vector<8x32xf32>
    %184 = vector.extract_strided_slice %181 {offsets = [0, 64], sizes = [8, 32], strides = [1, 1]} : vector<8x128xf32> to vector<8x32xf32>
    %185 = vector.extract_strided_slice %181 {offsets = [0, 96], sizes = [8, 32], strides = [1, 1]} : vector<8x128xf32> to vector<8x32xf32>
    %186 = arith.mulf %183, %166 : vector<8x32xf32>
    %187 = arith.mulf %182, %184 : vector<8x32xf32>
    %188 = arith.addf %186, %187 : vector<8x32xf32>
    %189 = math.tanh %188 : vector<8x32xf32>
    %190 = arith.mulf %185, %189 : vector<8x32xf32>
    %c7_75 = arith.constant 7 : index
    %c0_76 = arith.constant 0 : index
    %c0_77 = arith.constant 0 : index
    %191 = vector.load %arg12[%c7_75, %c0_76, %c0_77] : memref<8x8x32xf32, #tpu.memory_space<vmem>>, vector<1x8x32xf32>
    %192 = vector.shape_cast %191 : vector<1x8x32xf32> to vector<8x32xf32>
    %193 = vector.shape_cast %190 : vector<8x32xf32> to vector<1x8x32xf32>
    tpu.vector_store %arg12[%c7_75, %c0_76, %c0_77], %193 {strides = array<i32>} : memref<8x8x32xf32, #tpu.memory_space<vmem>>, vector<1x8x32xf32>,
    %c0_78 = arith.constant 0 : index
    %c0_79 = arith.constant 0 : index
    %194 = vector.load %arg5[%c0_78, %c0_79] : memref<32x128xf32, #tpu.memory_space<vmem>>, vector<32x128xf32>
    %c0_80 = arith.constant 0 : index
    %c0_81 = arith.constant 0 : index
    %195 = vector.load %arg6[%c0_80, %c0_81] : memref<32x128xf32, #tpu.memory_space<vmem>>, vector<32x128xf32>
    %c0_82 = arith.constant 0 : index
    %c0_83 = arith.constant 0 : index
    %196 = vector.load %arg7[%c0_82, %c0_83] : memref<1x128xf32, #tpu.memory_space<vmem>>, vector<1x128xf32>
    %c0_84 = arith.constant 0 : index
    %c0_85 = arith.constant 0 : index
    %c0_86 = arith.constant 0 : index
    %197 = vector.load %arg12[%c0_84, %c0_85, %c0_86] : memref<8x8x32xf32, #tpu.memory_space<vmem>>, vector<8x8x32xf32>
    %198 = vector.shape_cast %197 : vector<8x8x32xf32> to vector<64x32xf32>
    %cst_87 = arith.constant dense<0.000000e+00> : vector<64x128xf32>
    %199 = tpu.matmul %198, %194, %cst_87 {dimension_numbers = #tpu.dot_dimension_numbers<[1], [0], [0], [1], [0, 0, 1, 1], [], []>} : vector<64x32xf32>, vector<32x128xf32>, vector<64x128xf32> -> vector<64x128xf32>
    %200 = vector.broadcast %196 : vector<1x128xf32> to vector<64x128xf32>
    %201 = arith.addf %199, %200 : vector<64x128xf32>
    %202 = vector.shape_cast %201 : vector<64x128xf32> to vector<8x8x128xf32>
    %c0_88 = arith.constant 0 : index
    %c0_89 = arith.constant 0 : index
    %c0_90 = arith.constant 0 : index
    %203 = vector.load %arg11[%c0_88, %c0_89, %c0_90] : memref<8x8x128xf32, #tpu.memory_space<vmem>>, vector<8x8x128xf32>
    tpu.vector_store %arg11[%c0_88, %c0_89, %c0_90], %202 {strides = array<i32>} : memref<8x8x128xf32, #tpu.memory_space<vmem>>, vector<8x8x128xf32>,
    %cst_91 = arith.constant 0.000000e+00 : f32
    %204 = vector.broadcast %cst_91 : f32 to vector<8x32xf32>
    %cst_92 = arith.constant 0.000000e+00 : f32
    %205 = vector.broadcast %cst_92 : f32 to vector<8x32xf32>
    %c0_93 = arith.constant 0 : index
    %c0_94 = arith.constant 0 : index
    %c0_95 = arith.constant 0 : index
    %206 = vector.load %arg11[%c0_93, %c0_94, %c0_95] : memref<8x8x128xf32, #tpu.memory_space<vmem>>, vector<1x8x128xf32>
    %207 = vector.shape_cast %206 : vector<1x8x128xf32> to vector<8x128xf32>
    %cst_96 = arith.constant dense<0.000000e+00> : vector<8x128xf32>
    %208 = tpu.matmul %204, %195, %cst_96 {dimension_numbers = #tpu.dot_dimension_numbers<[1], [0], [0], [1], [0, 0, 1, 1], [], []>} : vector<8x32xf32>, vector<32x128xf32>, vector<8x128xf32> -> vector<8x128xf32>
    %209 = arith.addf %207, %208 : vector<8x128xf32>
    %210 = math.tanh %209 : vector<8x128xf32>
    %cst_97 = arith.constant 5.000000e-01 : f32
    %211 = vector.broadcast %cst_97 : f32 to vector<8x128xf32>
    %212 = arith.mulf %211, %210 : vector<8x128xf32>
    %cst_98 = arith.constant 5.000000e-01 : f32
    %213 = vector.broadcast %cst_98 : f32 to vector<8x128xf32>
    %214 = arith.addf %212, %213 : vector<8x128xf32>
    %215 = arith.select %5, %210, %214 : vector<8x128xi1>, vector<8x128xf32>
    %216 = vector.extract_strided_slice %215 {offsets = [0, 0], sizes = [8, 32], strides = [1, 1]} : vector<8x128xf32> to vector<8x32xf32>
    %217 = vector.extract_strided_slice %215 {offsets = [0, 32], sizes = [8, 32], strides = [1, 1]} : vector<8x128xf32> to vector<8x32xf32>
    %218 = vector.extract_strided_slice %215 {offsets = [0, 64], sizes = [8, 32], strides = [1, 1]} : vector<8x128xf32> to vector<8x32xf32>
    %219 = vector.extract_strided_slice %215 {offsets = [0, 96], sizes = [8, 32], strides = [1, 1]} : vector<8x128xf32> to vector<8x32xf32>
    %220 = arith.mulf %217, %205 : vector<8x32xf32>
    %221 = arith.mulf %216, %218 : vector<8x32xf32>
    %222 = arith.addf %220, %221 : vector<8x32xf32>
    %223 = math.tanh %222 : vector<8x32xf32>
    %224 = arith.mulf %219, %223 : vector<8x32xf32>
    %c1_99 = arith.constant 1 : index
    %c0_100 = arith.constant 0 : index
    %c0_101 = arith.constant 0 : index
    %225 = vector.load %arg11[%c1_99, %c0_100, %c0_101] : memref<8x8x128xf32, #tpu.memory_space<vmem>>, vector<1x8x128xf32>
    %226 = vector.shape_cast %225 : vector<1x8x128xf32> to vector<8x128xf32>
    %cst_102 = arith.constant dense<0.000000e+00> : vector<8x128xf32>
    %227 = tpu.matmul %224, %195, %cst_102 {dimension_numbers = #tpu.dot_dimension_numbers<[1], [0], [0], [1], [0, 0, 1, 1], [], []>} : vector<8x32xf32>, vector<32x128xf32>, vector<8x128xf32> -> vector<8x128xf32>
    %228 = arith.addf %226, %227 : vector<8x128xf32>
    %229 = math.tanh %228 : vector<8x128xf32>
    %cst_103 = arith.constant 5.000000e-01 : f32
    %230 = vector.broadcast %cst_103 : f32 to vector<8x128xf32>
    %231 = arith.mulf %230, %229 : vector<8x128xf32>
    %cst_104 = arith.constant 5.000000e-01 : f32
    %232 = vector.broadcast %cst_104 : f32 to vector<8x128xf32>
    %233 = arith.addf %231, %232 : vector<8x128xf32>
    %234 = arith.select %5, %229, %233 : vector<8x128xi1>, vector<8x128xf32>
    %235 = vector.extract_strided_slice %234 {offsets = [0, 0], sizes = [8, 32], strides = [1, 1]} : vector<8x128xf32> to vector<8x32xf32>
    %236 = vector.extract_strided_slice %234 {offsets = [0, 32], sizes = [8, 32], strides = [1, 1]} : vector<8x128xf32> to vector<8x32xf32>
    %237 = vector.extract_strided_slice %234 {offsets = [0, 64], sizes = [8, 32], strides = [1, 1]} : vector<8x128xf32> to vector<8x32xf32>
    %238 = vector.extract_strided_slice %234 {offsets = [0, 96], sizes = [8, 32], strides = [1, 1]} : vector<8x128xf32> to vector<8x32xf32>
    %239 = arith.mulf %236, %222 : vector<8x32xf32>
    %240 = arith.mulf %235, %237 : vector<8x32xf32>
    %241 = arith.addf %239, %240 : vector<8x32xf32>
    %242 = math.tanh %241 : vector<8x32xf32>
    %243 = arith.mulf %238, %242 : vector<8x32xf32>
    %c2_105 = arith.constant 2 : index
    %c0_106 = arith.constant 0 : index
    %c0_107 = arith.constant 0 : index
    %244 = vector.load %arg11[%c2_105, %c0_106, %c0_107] : memref<8x8x128xf32, #tpu.memory_space<vmem>>, vector<1x8x128xf32>
    %245 = vector.shape_cast %244 : vector<1x8x128xf32> to vector<8x128xf32>
    %cst_108 = arith.constant dense<0.000000e+00> : vector<8x128xf32>
    %246 = tpu.matmul %243, %195, %cst_108 {dimension_numbers = #tpu.dot_dimension_numbers<[1], [0], [0], [1], [0, 0, 1, 1], [], []>} : vector<8x32xf32>, vector<32x128xf32>, vector<8x128xf32> -> vector<8x128xf32>
    %247 = arith.addf %245, %246 : vector<8x128xf32>
    %248 = math.tanh %247 : vector<8x128xf32>
    %cst_109 = arith.constant 5.000000e-01 : f32
    %249 = vector.broadcast %cst_109 : f32 to vector<8x128xf32>
    %250 = arith.mulf %249, %248 : vector<8x128xf32>
    %cst_110 = arith.constant 5.000000e-01 : f32
    %251 = vector.broadcast %cst_110 : f32 to vector<8x128xf32>
    %252 = arith.addf %250, %251 : vector<8x128xf32>
    %253 = arith.select %5, %248, %252 : vector<8x128xi1>, vector<8x128xf32>
    %254 = vector.extract_strided_slice %253 {offsets = [0, 0], sizes = [8, 32], strides = [1, 1]} : vector<8x128xf32> to vector<8x32xf32>
    %255 = vector.extract_strided_slice %253 {offsets = [0, 32], sizes = [8, 32], strides = [1, 1]} : vector<8x128xf32> to vector<8x32xf32>
    %256 = vector.extract_strided_slice %253 {offsets = [0, 64], sizes = [8, 32], strides = [1, 1]} : vector<8x128xf32> to vector<8x32xf32>
    %257 = vector.extract_strided_slice %253 {offsets = [0, 96], sizes = [8, 32], strides = [1, 1]} : vector<8x128xf32> to vector<8x32xf32>
    %258 = arith.mulf %255, %241 : vector<8x32xf32>
    %259 = arith.mulf %254, %256 : vector<8x32xf32>
    %260 = arith.addf %258, %259 : vector<8x32xf32>
    %261 = math.tanh %260 : vector<8x32xf32>
    %262 = arith.mulf %257, %261 : vector<8x32xf32>
    %c3_111 = arith.constant 3 : index
    %c0_112 = arith.constant 0 : index
    %c0_113 = arith.constant 0 : index
    %263 = vector.load %arg11[%c3_111, %c0_112, %c0_113] : memref<8x8x128xf32, #tpu.memory_space<vmem>>, vector<1x8x128xf32>
    %264 = vector.shape_cast %263 : vector<1x8x128xf32> to vector<8x128xf32>
    %cst_114 = arith.constant dense<0.000000e+00> : vector<8x128xf32>
    %265 = tpu.matmul %262, %195, %cst_114 {dimension_numbers = #tpu.dot_dimension_numbers<[1], [0], [0], [1], [0, 0, 1, 1], [], []>} : vector<8x32xf32>, vector<32x128xf32>, vector<8x128xf32> -> vector<8x128xf32>
    %266 = arith.addf %264, %265 : vector<8x128xf32>
    %267 = math.tanh %266 : vector<8x128xf32>
    %cst_115 = arith.constant 5.000000e-01 : f32
    %268 = vector.broadcast %cst_115 : f32 to vector<8x128xf32>
    %269 = arith.mulf %268, %267 : vector<8x128xf32>
    %cst_116 = arith.constant 5.000000e-01 : f32
    %270 = vector.broadcast %cst_116 : f32 to vector<8x128xf32>
    %271 = arith.addf %269, %270 : vector<8x128xf32>
    %272 = arith.select %5, %267, %271 : vector<8x128xi1>, vector<8x128xf32>
    %273 = vector.extract_strided_slice %272 {offsets = [0, 0], sizes = [8, 32], strides = [1, 1]} : vector<8x128xf32> to vector<8x32xf32>
    %274 = vector.extract_strided_slice %272 {offsets = [0, 32], sizes = [8, 32], strides = [1, 1]} : vector<8x128xf32> to vector<8x32xf32>
    %275 = vector.extract_strided_slice %272 {offsets = [0, 64], sizes = [8, 32], strides = [1, 1]} : vector<8x128xf32> to vector<8x32xf32>
    %276 = vector.extract_strided_slice %272 {offsets = [0, 96], sizes = [8, 32], strides = [1, 1]} : vector<8x128xf32> to vector<8x32xf32>
    %277 = arith.mulf %274, %260 : vector<8x32xf32>
    %278 = arith.mulf %273, %275 : vector<8x32xf32>
    %279 = arith.addf %277, %278 : vector<8x32xf32>
    %280 = math.tanh %279 : vector<8x32xf32>
    %281 = arith.mulf %276, %280 : vector<8x32xf32>
    %c4_117 = arith.constant 4 : index
    %c0_118 = arith.constant 0 : index
    %c0_119 = arith.constant 0 : index
    %282 = vector.load %arg11[%c4_117, %c0_118, %c0_119] : memref<8x8x128xf32, #tpu.memory_space<vmem>>, vector<1x8x128xf32>
    %283 = vector.shape_cast %282 : vector<1x8x128xf32> to vector<8x128xf32>
    %cst_120 = arith.constant dense<0.000000e+00> : vector<8x128xf32>
    %284 = tpu.matmul %281, %195, %cst_120 {dimension_numbers = #tpu.dot_dimension_numbers<[1], [0], [0], [1], [0, 0, 1, 1], [], []>} : vector<8x32xf32>, vector<32x128xf32>, vector<8x128xf32> -> vector<8x128xf32>
    %285 = arith.addf %283, %284 : vector<8x128xf32>
    %286 = math.tanh %285 : vector<8x128xf32>
    %cst_121 = arith.constant 5.000000e-01 : f32
    %287 = vector.broadcast %cst_121 : f32 to vector<8x128xf32>
    %288 = arith.mulf %287, %286 : vector<8x128xf32>
    %cst_122 = arith.constant 5.000000e-01 : f32
    %289 = vector.broadcast %cst_122 : f32 to vector<8x128xf32>
    %290 = arith.addf %288, %289 : vector<8x128xf32>
    %291 = arith.select %5, %286, %290 : vector<8x128xi1>, vector<8x128xf32>
    %292 = vector.extract_strided_slice %291 {offsets = [0, 0], sizes = [8, 32], strides = [1, 1]} : vector<8x128xf32> to vector<8x32xf32>
    %293 = vector.extract_strided_slice %291 {offsets = [0, 32], sizes = [8, 32], strides = [1, 1]} : vector<8x128xf32> to vector<8x32xf32>
    %294 = vector.extract_strided_slice %291 {offsets = [0, 64], sizes = [8, 32], strides = [1, 1]} : vector<8x128xf32> to vector<8x32xf32>
    %295 = vector.extract_strided_slice %291 {offsets = [0, 96], sizes = [8, 32], strides = [1, 1]} : vector<8x128xf32> to vector<8x32xf32>
    %296 = arith.mulf %293, %279 : vector<8x32xf32>
    %297 = arith.mulf %292, %294 : vector<8x32xf32>
    %298 = arith.addf %296, %297 : vector<8x32xf32>
    %299 = math.tanh %298 : vector<8x32xf32>
    %300 = arith.mulf %295, %299 : vector<8x32xf32>
    %c5_123 = arith.constant 5 : index
    %c0_124 = arith.constant 0 : index
    %c0_125 = arith.constant 0 : index
    %301 = vector.load %arg11[%c5_123, %c0_124, %c0_125] : memref<8x8x128xf32, #tpu.memory_space<vmem>>, vector<1x8x128xf32>
    %302 = vector.shape_cast %301 : vector<1x8x128xf32> to vector<8x128xf32>
    %cst_126 = arith.constant dense<0.000000e+00> : vector<8x128xf32>
    %303 = tpu.matmul %300, %195, %cst_126 {dimension_numbers = #tpu.dot_dimension_numbers<[1], [0], [0], [1], [0, 0, 1, 1], [], []>} : vector<8x32xf32>, vector<32x128xf32>, vector<8x128xf32> -> vector<8x128xf32>
    %304 = arith.addf %302, %303 : vector<8x128xf32>
    %305 = math.tanh %304 : vector<8x128xf32>
    %cst_127 = arith.constant 5.000000e-01 : f32
    %306 = vector.broadcast %cst_127 : f32 to vector<8x128xf32>
    %307 = arith.mulf %306, %305 : vector<8x128xf32>
    %cst_128 = arith.constant 5.000000e-01 : f32
    %308 = vector.broadcast %cst_128 : f32 to vector<8x128xf32>
    %309 = arith.addf %307, %308 : vector<8x128xf32>
    %310 = arith.select %5, %305, %309 : vector<8x128xi1>, vector<8x128xf32>
    %311 = vector.extract_strided_slice %310 {offsets = [0, 0], sizes = [8, 32], strides = [1, 1]} : vector<8x128xf32> to vector<8x32xf32>
    %312 = vector.extract_strided_slice %310 {offsets = [0, 32], sizes = [8, 32], strides = [1, 1]} : vector<8x128xf32> to vector<8x32xf32>
    %313 = vector.extract_strided_slice %310 {offsets = [0, 64], sizes = [8, 32], strides = [1, 1]} : vector<8x128xf32> to vector<8x32xf32>
    %314 = vector.extract_strided_slice %310 {offsets = [0, 96], sizes = [8, 32], strides = [1, 1]} : vector<8x128xf32> to vector<8x32xf32>
    %315 = arith.mulf %312, %298 : vector<8x32xf32>
    %316 = arith.mulf %311, %313 : vector<8x32xf32>
    %317 = arith.addf %315, %316 : vector<8x32xf32>
    %318 = math.tanh %317 : vector<8x32xf32>
    %319 = arith.mulf %314, %318 : vector<8x32xf32>
    %c6_129 = arith.constant 6 : index
    %c0_130 = arith.constant 0 : index
    %c0_131 = arith.constant 0 : index
    %320 = vector.load %arg11[%c6_129, %c0_130, %c0_131] : memref<8x8x128xf32, #tpu.memory_space<vmem>>, vector<1x8x128xf32>
    %321 = vector.shape_cast %320 : vector<1x8x128xf32> to vector<8x128xf32>
    %cst_132 = arith.constant dense<0.000000e+00> : vector<8x128xf32>
    %322 = tpu.matmul %319, %195, %cst_132 {dimension_numbers = #tpu.dot_dimension_numbers<[1], [0], [0], [1], [0, 0, 1, 1], [], []>} : vector<8x32xf32>, vector<32x128xf32>, vector<8x128xf32> -> vector<8x128xf32>
    %323 = arith.addf %321, %322 : vector<8x128xf32>
    %324 = math.tanh %323 : vector<8x128xf32>
    %cst_133 = arith.constant 5.000000e-01 : f32
    %325 = vector.broadcast %cst_133 : f32 to vector<8x128xf32>
    %326 = arith.mulf %325, %324 : vector<8x128xf32>
    %cst_134 = arith.constant 5.000000e-01 : f32
    %327 = vector.broadcast %cst_134 : f32 to vector<8x128xf32>
    %328 = arith.addf %326, %327 : vector<8x128xf32>
    %329 = arith.select %5, %324, %328 : vector<8x128xi1>, vector<8x128xf32>
    %330 = vector.extract_strided_slice %329 {offsets = [0, 0], sizes = [8, 32], strides = [1, 1]} : vector<8x128xf32> to vector<8x32xf32>
    %331 = vector.extract_strided_slice %329 {offsets = [0, 32], sizes = [8, 32], strides = [1, 1]} : vector<8x128xf32> to vector<8x32xf32>
    %332 = vector.extract_strided_slice %329 {offsets = [0, 64], sizes = [8, 32], strides = [1, 1]} : vector<8x128xf32> to vector<8x32xf32>
    %333 = vector.extract_strided_slice %329 {offsets = [0, 96], sizes = [8, 32], strides = [1, 1]} : vector<8x128xf32> to vector<8x32xf32>
    %334 = arith.mulf %331, %317 : vector<8x32xf32>
    %335 = arith.mulf %330, %332 : vector<8x32xf32>
    %336 = arith.addf %334, %335 : vector<8x32xf32>
    %337 = math.tanh %336 : vector<8x32xf32>
    %338 = arith.mulf %333, %337 : vector<8x32xf32>
    %c7_135 = arith.constant 7 : index
    %c0_136 = arith.constant 0 : index
    %c0_137 = arith.constant 0 : index
    %339 = vector.load %arg11[%c7_135, %c0_136, %c0_137] : memref<8x8x128xf32, #tpu.memory_space<vmem>>, vector<1x8x128xf32>
    %340 = vector.shape_cast %339 : vector<1x8x128xf32> to vector<8x128xf32>
    %cst_138 = arith.constant dense<0.000000e+00> : vector<8x128xf32>
    %341 = tpu.matmul %338, %195, %cst_138 {dimension_numbers = #tpu.dot_dimension_numbers<[1], [0], [0], [1], [0, 0, 1, 1], [], []>} : vector<8x32xf32>, vector<32x128xf32>, vector<8x128xf32> -> vector<8x128xf32>
    %342 = arith.addf %340, %341 : vector<8x128xf32>
    %343 = math.tanh %342 : vector<8x128xf32>
    %cst_139 = arith.constant 5.000000e-01 : f32
    %344 = vector.broadcast %cst_139 : f32 to vector<8x128xf32>
    %345 = arith.mulf %344, %343 : vector<8x128xf32>
    %cst_140 = arith.constant 5.000000e-01 : f32
    %346 = vector.broadcast %cst_140 : f32 to vector<8x128xf32>
    %347 = arith.addf %345, %346 : vector<8x128xf32>
    %348 = arith.select %5, %343, %347 : vector<8x128xi1>, vector<8x128xf32>
    %349 = vector.extract_strided_slice %348 {offsets = [0, 0], sizes = [8, 32], strides = [1, 1]} : vector<8x128xf32> to vector<8x32xf32>
    %350 = vector.extract_strided_slice %348 {offsets = [0, 32], sizes = [8, 32], strides = [1, 1]} : vector<8x128xf32> to vector<8x32xf32>
    %351 = vector.extract_strided_slice %348 {offsets = [0, 64], sizes = [8, 32], strides = [1, 1]} : vector<8x128xf32> to vector<8x32xf32>
    %352 = vector.extract_strided_slice %348 {offsets = [0, 96], sizes = [8, 32], strides = [1, 1]} : vector<8x128xf32> to vector<8x32xf32>
    %353 = arith.mulf %350, %336 : vector<8x32xf32>
    %354 = arith.mulf %349, %351 : vector<8x32xf32>
    %355 = arith.addf %353, %354 : vector<8x32xf32>
    %356 = math.tanh %355 : vector<8x32xf32>
    %357 = arith.mulf %352, %356 : vector<8x32xf32>
    %c0_141 = arith.constant 0 : index
    %c0_142 = arith.constant 0 : index
    %358 = vector.load %arg8[%c0_141, %c0_142] : memref<32x128xf32, #tpu.memory_space<vmem>>, vector<32x128xf32>
    %cst_143 = arith.constant dense<0.000000e+00> : vector<8x128xf32>
    %359 = tpu.matmul %357, %358, %cst_143 {dimension_numbers = #tpu.dot_dimension_numbers<[1], [0], [0], [1], [0, 0, 1, 1], [], []>} : vector<8x32xf32>, vector<32x128xf32>, vector<8x128xf32> -> vector<8x128xf32>
    %c0_144 = arith.constant 0 : index
    %c0_145 = arith.constant 0 : index
    %360 = vector.load %arg9[%c0_144, %c0_145] : memref<1x128xf32, #tpu.memory_space<vmem>>, vector<1x128xf32>
    %361 = vector.broadcast %360 : vector<1x128xf32> to vector<8x128xf32>
    %362 = arith.addf %359, %361 : vector<8x128xf32>
    %363 = arith.negf %362 : vector<8x128xf32>
    %364 = math.exp %363 : vector<8x128xf32>
    %cst_146 = arith.constant 1.000000e+00 : f32
    %365 = vector.broadcast %cst_146 : f32 to vector<8x128xf32>
    %366 = arith.addf %365, %364 : vector<8x128xf32>
    %367 = arith.divf %365, %366 : vector<8x128xf32>
    %c0_147 = arith.constant 0 : index
    %c0_148 = arith.constant 0 : index
    %368 = vector.load %arg10[%c0_147, %c0_148] : memref<8x128xf32, #tpu.memory_space<vmem>>, vector<8x128xf32>
    tpu.vector_store %arg10[%c0_147, %c0_148], %367 {strides = array<i32>} : memref<8x128xf32, #tpu.memory_space<vmem>>, vector<8x128xf32>,
    return
  }
  func.func @transform_0(%arg0: i32) -> (i32, i32, i32) {
    %c0_i32 = arith.constant 0 : i32
    %c0_i32_0 = arith.constant 0 : i32
    %c0_i32_1 = arith.constant 0 : i32
    return %c0_i32, %arg0, %c0_i32_0 : i32, i32, i32
  }
  func.func @transform_1(%arg0: i32) -> (i32, i32) {
    %c0_i32 = arith.constant 0 : i32
    %c0_i32_0 = arith.constant 0 : i32
    %c0_i32_1 = arith.constant 0 : i32
    return %c0_i32, %c0_i32_0 : i32, i32
  }
  func.func @transform_2(%arg0: i32) -> (i32, i32) {
    %c0_i32 = arith.constant 0 : i32
    %c0_i32_0 = arith.constant 0 : i32
    %c0_i32_1 = arith.constant 0 : i32
    return %c0_i32, %c0_i32_0 : i32, i32
  }
  func.func @transform_3(%arg0: i32) -> (i32, i32) {
    %c0_i32 = arith.constant 0 : i32
    %c0_i32_0 = arith.constant 0 : i32
    %c0_i32_1 = arith.constant 0 : i32
    return %c0_i32, %c0_i32_0 : i32, i32
  }
  func.func @transform_4(%arg0: i32) -> (i32, i32) {
    %c0_i32 = arith.constant 0 : i32
    %c0_i32_0 = arith.constant 0 : i32
    %c0_i32_1 = arith.constant 0 : i32
    return %c0_i32, %c0_i32_0 : i32, i32
  }
  func.func @transform_5(%arg0: i32) -> (i32, i32) {
    %c0_i32 = arith.constant 0 : i32
    %c0_i32_0 = arith.constant 0 : i32
    %c0_i32_1 = arith.constant 0 : i32
    return %c0_i32, %c0_i32_0 : i32, i32
  }
  func.func @transform_6(%arg0: i32) -> (i32, i32) {
    %c0_i32 = arith.constant 0 : i32
    %c0_i32_0 = arith.constant 0 : i32
    %c0_i32_1 = arith.constant 0 : i32
    return %c0_i32, %c0_i32_0 : i32, i32
  }
  func.func @transform_7(%arg0: i32) -> (i32, i32) {
    %c0_i32 = arith.constant 0 : i32
    %c0_i32_0 = arith.constant 0 : i32
    %c0_i32_1 = arith.constant 0 : i32
    return %c0_i32, %c0_i32_0 : i32, i32
  }
  func.func @transform_8(%arg0: i32) -> (i32, i32) {
    %c0_i32 = arith.constant 0 : i32
    %c0_i32_0 = arith.constant 0 : i32
    %c0_i32_1 = arith.constant 0 : i32
    return %c0_i32, %c0_i32_0 : i32, i32
  }
  func.func @transform_9(%arg0: i32) -> (i32, i32) {
    %c0_i32 = arith.constant 0 : i32
    %c0_i32_0 = arith.constant 0 : i32
    return %arg0, %c0_i32 : i32, i32
  }
}

</mosaic_0001>

<bundles_post_ra>
// kernel: tpu_custom_call.1
= control target key start
LH: loop header
LB: loop body
LE: loop exit
PB: predicated region body
PF: predicated region fallthrough
CT: control target
= control target key end

     0   :  { %14 = vsyncpa [#allocation5], 0  ;;  %s3383_s0 = inlined_call_operand.hbm [shape: f32[8,8,32], index: 0, kind: input, shape index: {}]   ;;  %s3384_s1 = inlined_call_operand.hbm [shape: f32[32,128], index: 1, kind: input, shape index: {}]   ;;  %s3385_s2 = inlined_call_operand.hbm [shape: f32[32,128], index: 2, kind: input, shape index: {}]   ;;  %s3386_s3 = inlined_call_operand.vmem [shape: f32[1,128], index: 3, kind: input, shape index: {}]   ;;  %s3387_s4 = inlined_call_operand.hbm [shape: f32[32,128], index: 4, kind: input, shape index: {}]   ;;  %s3388_s5 = inlined_call_operand.hbm [shape: f32[32,128], index: 5, kind: input, shape index: {}]   ;;  %s3389_s6 = inlined_call_operand.vmem [shape: f32[1,128], index: 6, kind: input, shape index: {}]   ;;  %s3390_s7 = inlined_call_operand.hbm [shape: f32[32,128], index: 7, kind: input, shape index: {}]   ;;  %s3391_s8 = inlined_call_operand.vmem [shape: f32[1,128], index: 8, kind: input, shape index: {}]   ;;  %s3392_s9 = inlined_call_operand.hbm [shape: f32[8,128], index: 9, kind: output, shape index: {}]  }
   0x1   :  { %15 = vsyncpa [#allocation8], 0 }
   0x2   :  { %16 = vsyncpa [#allocation11], 0 }
   0x3   :  { %17 = vsyncpa [#allocation14], 0 }
   0x4   :  { %18 = vsyncpa [#allocation6], 0  ;;  %s2881_s30 = smov [#allocation7]   ;;  %s2882_s11 = smov [#allocation10]  }
   0x5   :  { %s36_s10 = sshll.u32 %s2881_s30, 4  ;;  %s62_s12 = sshll.u32 %s2882_s11, 4  ;;  %s37_s10 = int_to_ptr.vmem [resolvable:$true] %s36_s10  ;;  %s2945_s12 = int_to_ptr.vmem [resolvable:$true] %s62_s12 }
   0x6   :  { %s2717_s15 = scalar_lea.hbm %s3384_s1, 512 }
   0x7   :  { %p2718_p0 = scmp.ne.s32.totalorder %s3384_s1, %s2717_s15  ;;  %p2721_p1 = scmp.lt.u32.totalorder %s2717_s15, %s3384_s1 }
   0x9   :  { %p2723_p2 = pnand %p2721_p1, %p2718_p0 }
   0xb   :  { %2726 = shalt.err (!%p2723_p2)
}
   0xc   :  { %s2727_s20 = scalar_lea.vmem %s37_s10, 512  ;;  %p2732_p4 = scmp.lt.s32.totalorder %s37_s10, %s37_s10 }
   0xd   :  { %p2728_p3 = scmp.ne.s32.totalorder %s37_s10, %s2727_s20  ;;  %p2733_p5 = scmp.lt.s32.totalorder %s2727_s20, %s2727_s20 }
   0xf   :  { %p2734_p6 = por %p2733_p5, %p2732_p4 }
  0x11   :  { %p2735_p7 = pnand %p2734_p6, %p2728_p3 }
  0x13   :  { %2738 = shalt.err (!%p2735_p7)
}
  0x14   :  { %s2883_s21 = smov 128   ;;  %s2884_s22 = smov 8  }
  0x15   :  { %42 = dma.hbm_to_vmem [thread:$0]  %s3384_s1, 512, %s37_s10, [#allocation8], %s2883_s21, %s2883_s21, %s2884_s22  }
  0x16   :  { %s2739_s27 = scalar_lea.hbm %s3387_s4, 512 }
  0x17   :  { %p2740_p8 = scmp.ne.s32.totalorder %s3387_s4, %s2739_s27  ;;  %p2743_p9 = scmp.lt.u32.totalorder %s2739_s27, %s3387_s4 }
  0x19   :  { %p2745_p10 = pnand %p2743_p9, %p2740_p8 }
  0x1b   :  { %2748 = shalt.err (!%p2745_p10)
}
  0x1c   :  { %s2749_s13 = scalar_lea.vmem %s2945_s12, 512  ;;  %p2754_p12 = scmp.lt.s32.totalorder %s2945_s12, %s2945_s12 }
  0x1d   :  { %p2750_p11 = scmp.ne.s32.totalorder %s2945_s12, %s2749_s13  ;;  %p2755_p13 = scmp.lt.s32.totalorder %s2749_s13, %s2749_s13 }
  0x1f   :  { %p2756_p0 = por %p2755_p13, %p2754_p12 }
  0x21   :  { %p2757_p1 = pnand %p2756_p0, %p2750_p11 }
  0x23   :  { %2760 = shalt.err (!%p2757_p1)
}
  0x24   :  { %68 = dma.hbm_to_vmem [thread:$0]  %s3387_s4, 512, %s2945_s12, [#allocation11], %s2883_s21, %s2883_s21, %s2884_s22  }
  0x25   :  { %s2885_s14 = smov [#allocation4]   ;;  %s2886_s16 = smov [#allocation9]  }
  0x26   :  { %s24_s15 = sshll.u32 %s2885_s14, 4  ;;  %s48_s17 = sshll.u32 %s2886_s16, 4  ;;  %s25_s15 = int_to_ptr.vmem [resolvable:$true] %s24_s15  ;;  %s2982_s17 = int_to_ptr.vmem [resolvable:$true] %s48_s17 }
  0x27   :  { %s2761_s20 = scalar_lea.hbm %s3383_s0, 1024 }
  0x28   :  { %p2762_p2 = scmp.ne.s32.totalorder %s3383_s0, %s2761_s20  ;;  %p2765_p3 = scmp.lt.u32.totalorder %s2761_s20, %s3383_s0 }
  0x2a   :  { %p2767_p4 = pnand %p2765_p3, %p2762_p2 }
  0x2c   :  { %2770 = shalt.err (!%p2767_p4)
}
  0x2d   :  { %s2771_s4 = scalar_lea.vmem %s25_s15, 1024  ;;  %p2776_p6 = scmp.lt.s32.totalorder %s25_s15, %s25_s15 }
  0x2e   :  { %p2772_p5 = scmp.ne.s32.totalorder %s25_s15, %s2771_s4  ;;  %p2777_p7 = scmp.lt.s32.totalorder %s2771_s4, %s2771_s4 }
  0x30   :  { %p2778_p8 = por %p2777_p7, %p2776_p6 }
  0x32   :  { %p2779_p9 = pnand %p2778_p8, %p2772_p5 }
  0x34   :  { %2782 = shalt.err (!%p2779_p9)
}
  0x35   :  { %30 = dma.hbm_to_vmem [thread:$0]  %s3383_s0, 1024, %s25_s15, [#allocation5], %s2883_s21, %s2883_s21, %s2884_s22  }
  0x36   :  { %s2783_s30 = scalar_lea.hbm %s3385_s2, 512 }
  0x37   :  { %p2784_p10 = scmp.ne.s32.totalorder %s3385_s2, %s2783_s30  ;;  %p2787_p11 = scmp.lt.u32.totalorder %s2783_s30, %s3385_s2 }
  0x39   :  { %p2789_p12 = pnand %p2787_p11, %p2784_p10 }
  0x3b   :  { %2792 = shalt.err (!%p2789_p12)
}
  0x3c   :  { %s2793_s14 = scalar_lea.vmem %s2982_s17, 512  ;;  %p2798_p0 = scmp.lt.s32.totalorder %s2982_s17, %s2982_s17 }
  0x3d   :  { %p2794_p13 = scmp.ne.s32.totalorder %s2982_s17, %s2793_s14  ;;  %p2799_p1 = scmp.lt.s32.totalorder %s2793_s14, %s2793_s14 }
  0x3f   :  { %p2800_p2 = por %p2799_p1, %p2798_p0 }
  0x41   :  { %p2801_p3 = pnand %p2800_p2, %p2794_p13 }
  0x43   :  { %2804 = shalt.err (!%p2801_p3)
}
  0x44   :  { %54 = dma.hbm_to_vmem [thread:$0]  %s3385_s2, 512, %s2982_s17, [#allocation8], %s2883_s21, %s2883_s21, %s2884_s22  }
  0x45   :  { %s2887_s16 = smov [#allocation12]   ;;  %s2888_s19 = smov [#allocation13]  }
  0x46   :  { %s74_s18 = sshll.u32 %s2887_s16, 4  ;;  %s88_s20 = sshll.u32 %s2888_s19, 4  ;;  %s75_s18 = int_to_ptr.vmem [resolvable:$true] %s74_s18  ;;  %s3019_s20 = int_to_ptr.vmem [resolvable:$true] %s88_s20 }
  0x47   :  { %s2805_s25 = scalar_lea.hbm %s3388_s5, 512 }
  0x48   :  { %p2806_p4 = scmp.ne.s32.totalorder %s3388_s5, %s2805_s25  ;;  %p2809_p5 = scmp.lt.u32.totalorder %s2805_s25, %s3388_s5 }
  0x4a   :  { %p2811_p6 = pnand %p2809_p5, %p2806_p4 }
  0x4c   :  { %2814 = shalt.err (!%p2811_p6)
}
  0x4d   :  { %s2815_s2 = scalar_lea.vmem %s75_s18, 512  ;;  %p2820_p8 = scmp.lt.s32.totalorder %s75_s18, %s75_s18 }
  0x4e   :  { %p2816_p7 = scmp.ne.s32.totalorder %s75_s18, %s2815_s2  ;;  %p2821_p9 = scmp.lt.s32.totalorder %s2815_s2, %s2815_s2 }
  0x50   :  { %p2822_p10 = por %p2821_p9, %p2820_p8 }
  0x52   :  { %p2823_p11 = pnand %p2822_p10, %p2816_p7 }
  0x54   :  { %2826 = shalt.err (!%p2823_p11)
}
  0x55   :  { %80 = dma.hbm_to_vmem [thread:$0]  %s3388_s5, 512, %s75_s18, [#allocation11], %s2883_s21, %s2883_s21, %s2884_s22  }
  0x56   :  { %s2827_s11 = scalar_lea.hbm %s3390_s7, 512 }
  0x57   :  { %p2828_p12 = scmp.ne.s32.totalorder %s3390_s7, %s2827_s11  ;;  %p2831_p13 = scmp.lt.u32.totalorder %s2827_s11, %s3390_s7 }
  0x59   :  { %p2833_p0 = pnand %p2831_p13, %p2828_p12 }
  0x5b   :  { %2836 = shalt.err (!%p2833_p0)
}
  0x5c   :  { %s2837_s0 = scalar_lea.vmem %s3019_s20, 512  ;;  %p2842_p2 = scmp.lt.s32.totalorder %s3019_s20, %s3019_s20 }
  0x5d   :  { %p2838_p1 = scmp.ne.s32.totalorder %s3019_s20, %s2837_s0  ;;  %p2843_p3 = scmp.lt.s32.totalorder %s2837_s0, %s2837_s0 }
  0x5f   :  { %p2844_p4 = por %p2843_p3, %p2842_p2 }
  0x61   :  { %p2845_p5 = pnand %p2844_p4, %p2838_p1 }
  0x63   :  { %2848 = shalt.err (!%p2845_p5)
}
  0x64   :  { %94 = dma.hbm_to_vmem [thread:$0]  %s3390_s7, 512, %s3019_s20, [#allocation14], %s2883_s21, %s2883_s21, %s2884_s22  }
  0x65   :  { %2871 = dma.done.wait [#allocation5], 1024  }
  0x66   :  { %2872 = vsyncadd [#allocation5], 4294966272 }
  0x67   :  { %2873 = dma.done.wait [#allocation8], 1024  }
  0x68   :  { %2874 = vsyncadd [#allocation8], 4294966272 }
  0x69   :  { %2875 = dma.done.wait [#allocation11], 1024  }
  0x6a   :  { %2876 = vsyncadd [#allocation11], 4294966272 }
  0x6b   :  { %2877 = dma.done.wait [#allocation14], 512  }
  0x6c   :  { %2878 = vsyncadd [#allocation14], 4294966784  ;;  %v2889_v0 = vmov 0.0|0.0   ;;  %vm2890_vm0 = vmmov 0   ;;  %v2891_v1 = vmov 0.0   ;;  %v120_v2 = vld [vmem:[#allocation7] sm:$0xff]  ;;  %v115_v23 = vlaneseq }
  0x6d   :  { %2525 = vmatprep.subr.bf16.mxu1 %v2889_v0  ;;  %2318 = vmatprep.mubr.msk.f32.mxu1 %vm2890_vm0, %v2891_v1  ;;  %v121_v3 = vld [vmem:[#allocation7 + $0x8] sm:$0xff]  ;;  %v124_v4 = vld [vmem:[#allocation9] sm:$0xff]  ;;  %vm143_vm1 = vcmask 261120   ;;  %v122_v7 = vld [vmem:[#allocation7 + $0x10] sm:$0xff]  ;;  %s2893_s22 = smov 32   ;;  %s2894_s20 = smov [#allocation15]  }
  0x6e   :  { %v2517_v5 = vpack.c.bf16 %v121_v3, %v120_v2  ;;  %v125_v6 = vld [vmem:[#allocation9 + $0x8] sm:$0xff]  ;;  %v123_v8 = vld [vmem:[#allocation7 + $0x18] sm:$0xff]  ;;  %v129_v11 = vld [vmem:[#allocation4] sm:$0xff]  ;;  %v116_v24 = vand.u32 127, %v115_v23  ;;  %s2134_s23 = sshll.u32 %s2894_s20, 4  ;;  %s2135_s23 = int_to_ptr.vmem [resolvable:$true] %s2134_s23 }
  0x6f   :  { %v3059_v9 = vpack.c.bf16 %v125_v6, %v124_v4  ;;  %v2521_v10 = vpack.c.bf16 %v123_v8, %v122_v7  ;;  %v126_v12 = vld [vmem:[#allocation9 + $0x10] sm:$0xff]  ;;  %v127_v13 = vld [vmem:[#allocation9 + $0x18] sm:$0xff]  ;;  %2298 = vmatprep.mubr.msk.f32.mxu0 %vm143_vm1, %v129_v11  ;;  %v130_v15 = vld [vmem:[#allocation4 + $0x8] sm:$0xff]  ;;  %s2849_s24 = scalar_lea.vmem %s2135_s23, 128  ;;  %p2854_p7 = scmp.lt.s32.totalorder %s2135_s23, %s2135_s23 }
  0x70   :  { %2518 = vmatprep.subr.bf16.mxu0 %v2517_v5  ;;  %v3063_v14 = vpack.c.bf16 %v127_v13, %v126_v12  ;;  %v3084_v16 = vld [vmem:[%s3386_s3] ss:$0 sm:$0xff]  ;;  %vm117_vm2 = vcmp.ge.s32.totalorder %v116_v24, 64  ;;  %vm118_vm3 = vcmp.lt.s32.totalorder %v116_v24, 96  ;;  %s2892_s3 = smov 64   ;;  %v131_v52 = vld [vmem:[#allocation4 + $0x10] sm:$0xff]  ;;  %p2850_p6 = scmp.ne.s32.totalorder %s2135_s23, %s2849_s24 }
  0x71   :  { %2520 = vmatpush3.bf16.msra.mxu0 %v2517_v5  ;;  %2527 = vmatpush3.bf16.msra.mxu1 %v3059_v9  ;;  %vm3087_vm4 = vmand %vm117_vm2, %vm118_vm3  ;;  %v132_v53 = vld [vmem:[#allocation4 + $0x18] sm:$0xff]  ;;  %v133_v54 = vld [vmem:[#allocation4 + $0x20] sm:$0xff]  ;;  %p2855_p8 = scmp.lt.s32.totalorder %s2849_s24, %s2849_s24 }
  0x72   :  { %2522 = vmatprep.subr.bf16.mxu0 %v2521_v10  ;;  %2528 = vmatprep.subr.bf16.mxu1 %v2889_v0  ;;  %v134_v55 = vld [vmem:[#allocation4 + $0x28] sm:$0xff]  ;;  %v135_v56 = vld [vmem:[#allocation4 + $0x30] sm:$0xff]  ;;  %v136_v57 = vld [vmem:[#allocation4 + $0x38] sm:$0xff] }
  0x73   :  { %p2856_p9 = por %p2855_p8, %p2854_p7 }
  0x75   :  { %2524 = vmatpush3.bf16.msra.mxu0 %v2521_v10  ;;  %2530 = vmatpush3.bf16.msra.mxu1 %v3063_v14  ;;  %p2857_p10 = pnand %p2856_p9, %p2850_p6 }
  0x76   :  { %2531 = vmatprep.subr.bf16.mxu1 %v2889_v0  ;;  %2537 = vmatprep.subr.bf16.mxu0 %v2889_v0 }
  0x78   :  { %2299 = vmatmul.mubr.msk.f32.vlgmr.msra.gmra.mrb[0].mxu0 %vm143_vm1, %v130_v15  ;;  %2319 = vmatmul.mubr.f32.vlgmr.msra.gmra.mrb[0].mxu1 %v2891_v1 }
  0x79   :  { %2533 = vmatpush3.bf16.msra.mxu1 %v3059_v9  ;;  %2329 = vmatprep.mubr.msk.f32.mxu1 %vm2890_vm0, %v2891_v1 }
  0x7a   :  { %2534 = vmatprep.subr.bf16.mxu1 %v2889_v0  ;;  %2539 = vmatpush3.bf16.msra.mxu0 %v3059_v9 }
  0x7b   :  { %2540 = vmatprep.subr.bf16.mxu0 %v2889_v0  ;;  %2301 = vmatprep.mubr.msk.f32.mxu0 %vm143_vm1, %v131_v52 }
  0x7c   :  { %2302 = vmatmul.mubr.msk.f32.gmra.mrb[2].mxu0 %vm143_vm1, %v132_v53 }
  0x7d   :  { %2536 = vmatpush3.bf16.msra.mxu1 %v3063_v14  ;;  %2304 = vmatprep.mubr.msk.f32.mxu0 %vm143_vm1, %v133_v54 }
  0x7e   :  { %2542 = vmatpush3.bf16.msra.mxu0 %v3063_v14  ;;  %2543 = vmatprep.subr.bf16.mxu1 %v2889_v0 }
  0x7f   :  { %2549 = vmatprep.subr.bf16.mxu0 %v2889_v0 }
  0x80   :  { %2305 = vmatmul.mubr.msk.f32.gmra.mrb[4].mxu0 %vm143_vm1, %v134_v55 }
  0x81   :  { %2307 = vmatprep.mubr.msk.f32.mxu0 %vm143_vm1, %v135_v56 }
  0x84   :  { %2308 = vmatmul.mubr.msk.f32.gmra.mrb[6].mxu0 %vm143_vm1, %v136_v57 }
  0x85   :  { %2340 = vmatprep.mubr.msk.f32.mxu0 %vm2890_vm0, %v2891_v1 }
 0x14b   :  { %v2300_v17 = vpop.f32.mrb[0].mxu0  ;;  %v351_v18 = vpop.f32.mrb[0].mxu1 }
 0x14c   :  { %v234_v19 = vpop.f32.mrb[1].mxu0  ;;  %v2320_v20 = vpop.f32.mrb[1].mxu1  ;;  %v240_v39 = vadd.f32 %v2300_v17, %v3084_v16 }
 0x14d   :  { %v235_v21 = vadd.f32 %v3084_v16, %v234_v19 }
 0x14f   :  { %v355_v22 = vadd.f32 %v351_v18, %v235_v21  ;;  %v2303_v61 = vpop.f32.mrb[2].mxu0 }
 0x150   :  { %v244_v62 = vpop.f32.mrb[3].mxu0 }
 0x151   :  { %2649 = vtanh.f32 %v355_v22  ;;  %v245_v6 = vadd.f32 %v3084_v16, %v244_v62 }
 0x153   :  { %v3120_v63 = vpop.f32.mrb[4].mxu0 }
 0x154   :  { %v3122_v2 = vpop.f32.mrb[5].mxu0 }
 0x157   :  { %v3124_v3 = vpop.f32.mrb[6].mxu0 }
 0x158   :  { %v3126_v4 = vpop.f32.mrb[7].mxu0 }
 0x15b   :  { %v2650_v25 = vpop.eup %2649 }
 0x15c   :  { %v357_v26 = vmul.f32 0.5, %v2650_v25 }
 0x15e   :  { %v358_v28 = vadd.f32 0.5, %v357_v26  ;;  %v250_v26 = vadd.f32 %v2303_v61, %v3084_v16  ;;  %v260_v61 = vadd.f32 %v3120_v63, %v3084_v16  ;;  %v1096_v63 = vld [vmem:[#allocation10] sm:$0xff] }
 0x160   :  { %v359_v29 = vsel %vm3087_vm4, %v2650_v25, %v358_v28 }
 0x161   :  { %362 = vrot.lane.b32.xlu0 %v359_v29, %s2892_s3  ;;  %v360_v32 = vmul.f32 0.0, %v359_v29 }
 0x1d3   :  { %v363_v30 = vpop.permute.xlu0 %362 }
 0x1d4   :  { %v365_v31 = vmul.f32 %v363_v30, %v359_v29 }
 0x1d6   :  { %367 = vrot.lane.b32.xlu0 %v365_v31, %s2893_s22 }
 0x248   :  { %v368_v33 = vpop.permute.xlu0 %367 }
 0x249   :  { %v370_v34 = vadd.f32 %v368_v33, %v360_v32 }
 0x24b   :  { %2651 = vtanh.f32 %v370_v34 }
 0x255   :  { %v2652_v35 = vpop.eup %2651 }
 0x256   :  { %373 = vrot.lane.b32.xlu1 %v2652_v35, %s2892_s3 }
 0x2c8   :  { %v374_v36 = vpop.permute.xlu1 %373 }
 0x2c9   :  { %v376_v37 = vmul.f32 %v374_v36, %v359_v29 }
 0x2cb   :  { %378 = vrot.lane.b32.xlu1 %v376_v37, %s2893_s22 }
 0x33d   :  { %v379_v38 = vpop.permute.xlu1 %378 }
 0x33e   :  { %381 = vst.msk [vmem:[#allocation3] sm:$0xff] %vm143_vm1, %v379_v38  ;;  %2330 = vmatmul.mubr.msk.f32.vlgmr.msra.gmra.mrb[2].mxu1 %vm143_vm1, %v379_v38 }
 0x33f   :  { %2545 = vmatpush3.bf16.msra.mxu1 %v3059_v9  ;;  %2351 = vmatprep.mubr.msk.f32.mxu1 %vm2890_vm0, %v2891_v1 }
 0x340   :  { %2546 = vmatprep.subr.bf16.mxu1 %v2889_v0 }
 0x343   :  { %2548 = vmatpush3.bf16.msra.mxu1 %v3063_v14 }
 0x344   :  { %2555 = vmatprep.subr.bf16.mxu1 %v2889_v0 }
 0x411   :  { %v452_v40 = vpop.f32.mrb[2].mxu1 }
 0x412   :  { %v456_v41 = vadd.f32 %v452_v40, %v240_v39  ;;  %v2331_v42 = vpop.f32.mrb[3].mxu1 }
 0x414   :  { %2653 = vtanh.f32 %v456_v41 }
 0x41e   :  { %v2654_v43 = vpop.eup %2653 }
 0x41f   :  { %v458_v44 = vmul.f32 0.5, %v2654_v43 }
 0x421   :  { %v459_v45 = vadd.f32 0.5, %v458_v44  ;;  %v255_v44 = vadd.f32 %v3084_v16, %v3122_v2 }
 0x423   :  { %v460_v46 = vsel %vm3087_vm4, %v2654_v43, %v459_v45 }
 0x424   :  { %463 = vrot.lane.b32.xlu0 %v460_v46, %s2892_s3  ;;  %v461_v49 = vmul.f32 %v460_v46, %v370_v34 }
 0x496   :  { %v464_v47 = vpop.permute.xlu0 %463 }
 0x497   :  { %v466_v48 = vmul.f32 %v464_v47, %v460_v46 }
 0x499   :  { %468 = vrot.lane.b32.xlu1 %v466_v48, %s2893_s22 }
 0x50b   :  { %v469_v50 = vpop.permute.xlu1 %468 }
 0x50c   :  { %v471_v51 = vadd.f32 %v469_v50, %v461_v49 }
 0x50e   :  { %2655 = vtanh.f32 %v471_v51 }
 0x518   :  { %v2656_v58 = vpop.eup %2655 }
 0x519   :  { %474 = vrot.lane.b32.xlu0 %v2656_v58, %s2892_s3 }
 0x58b   :  { %v475_v59 = vpop.permute.xlu0 %474 }
 0x58c   :  { %v477_v60 = vmul.f32 %v475_v59, %v460_v46 }
 0x58e   :  { %479 = vrot.lane.b32.xlu1 %v477_v60, %s2893_s22 }
 0x600   :  { %v480_v5 = vpop.permute.xlu1 %479 }
 0x601   :  { %483 = vst.msk [vmem:[#allocation3 + $0x8] sm:$0xff] %vm143_vm1, %v480_v5  ;;  %2341 = vmatmul.mubr.msk.f32.vlgmr.msra.gmra.mrb[8].mxu0 %vm143_vm1, %v480_v5 }
 0x602   :  { %2551 = vmatpush3.bf16.msra.mxu0 %v3059_v9  ;;  %2362 = vmatprep.mubr.msk.f32.mxu0 %vm2890_vm0, %v2891_v1 }
 0x603   :  { %2552 = vmatprep.subr.bf16.mxu0 %v2889_v0 }
 0x606   :  { %2554 = vmatpush3.bf16.msra.mxu0 %v3063_v14 }
 0x607   :  { %2561 = vmatprep.subr.bf16.mxu0 %v2889_v0 }
 0x6d4   :  { %v554_v7 = vpop.f32.mrb[8].mxu0 }
 0x6d5   :  { %v558_v8 = vadd.f32 %v554_v7, %v245_v6  ;;  %v2342_v10 = vpop.f32.mrb[9].mxu0 }
 0x6d7   :  { %2657 = vtanh.f32 %v558_v8 }
 0x6e1   :  { %v2658_v11 = vpop.eup %2657 }
 0x6e2   :  { %v560_v12 = vmul.f32 0.5, %v2658_v11 }
 0x6e4   :  { %v561_v13 = vadd.f32 0.5, %v560_v12 }
 0x6e6   :  { %v562_v15 = vsel %vm3087_vm4, %v2658_v11, %v561_v13 }
 0x6e7   :  { %565 = vrot.lane.b32.xlu0 %v562_v15, %s2892_s3  ;;  %v563_v19 = vmul.f32 %v562_v15, %v471_v51 }
 0x759   :  { %v566_v17 = vpop.permute.xlu0 %565 }
 0x75a   :  { %v568_v18 = vmul.f32 %v566_v17, %v562_v15 }
 0x75c   :  { %570 = vrot.lane.b32.xlu1 %v568_v18, %s2893_s22 }
 0x7ce   :  { %v571_v20 = vpop.permute.xlu1 %570 }
 0x7cf   :  { %v573_v21 = vadd.f32 %v571_v20, %v563_v19 }
 0x7d1   :  { %2659 = vtanh.f32 %v573_v21 }
 0x7db   :  { %v2660_v22 = vpop.eup %2659 }
 0x7dc   :  { %576 = vrot.lane.b32.xlu0 %v2660_v22, %s2892_s3  ;;  %v1099_v22 = vld [vmem:[#allocation10 + $0x18] sm:$0xff] }
 0x84e   :  { %v577_v23 = vpop.permute.xlu0 %576 }
 0x84f   :  { %v579_v24 = vmul.f32 %v577_v23, %v562_v15  ;;  %v1097_v15 = vld [vmem:[#allocation10 + $0x8] sm:$0xff] }
 0x850   :  { %v2573_v17 = vpack.c.bf16 %v1097_v15, %v1096_v63 }
 0x851   :  { %581 = vrot.lane.b32.xlu1 %v579_v24, %s2893_s22 }
 0x8c3   :  { %v582_v25 = vpop.permute.xlu1 %581 }
 0x8c4   :  { %585 = vst.msk [vmem:[#allocation3 + $0x10] sm:$0xff] %vm143_vm1, %v582_v25  ;;  %2352 = vmatmul.mubr.msk.f32.vlgmr.msra.gmra.mrb[4].mxu1 %vm143_vm1, %v582_v25  ;;  %v1105_v25 = vld [vmem:[#allocation3] sm:$0xff] }
 0x8c5   :  { %2557 = vmatpush3.bf16.msra.mxu1 %v3059_v9  ;;  %2373 = vmatprep.mubr.msk.f32.mxu1 %vm2890_vm0, %v2891_v1 }
 0x8c6   :  { %2558 = vmatprep.subr.bf16.mxu1 %v2889_v0 }
 0x8c9   :  { %2560 = vmatpush3.bf16.msra.mxu1 %v3063_v14 }
 0x8ca   :  { %2567 = vmatprep.subr.bf16.mxu1 %v2889_v0 }
 0x997   :  { %v656_v28 = vpop.f32.mrb[4].mxu1 }
 0x998   :  { %v660_v29 = vadd.f32 %v656_v28, %v250_v26  ;;  %v2353_v30 = vpop.f32.mrb[5].mxu1  ;;  %v1106_v26 = vld [vmem:[#allocation3 + $0x8] sm:$0xff]  ;;  %v1107_v28 = vld [vmem:[#allocation3 + $0x10] sm:$0xff] }
 0x99a   :  { %2661 = vtanh.f32 %v660_v29 }
 0x9a4   :  { %v2662_v31 = vpop.eup %2661 }
 0x9a5   :  { %v662_v32 = vmul.f32 0.5, %v2662_v31 }
 0x9a7   :  { %v663_v33 = vadd.f32 0.5, %v662_v32  ;;  %v265_v32 = vadd.f32 %v3084_v16, %v3126_v4 }
 0x9a9   :  { %v664_v34 = vsel %vm3087_vm4, %v2662_v31, %v663_v33 }
 0x9aa   :  { %667 = vrot.lane.b32.xlu0 %v664_v34, %s2892_s3  ;;  %v665_v37 = vmul.f32 %v664_v34, %v573_v21  ;;  %v1098_v21 = vld [vmem:[#allocation10 + $0x10] sm:$0xff] }
 0x9ab   :  { %v2577_v23 = vpack.c.bf16 %v1099_v22, %v1098_v21 }
 0xa1c   :  { %v668_v35 = vpop.permute.xlu0 %667 }
 0xa1d   :  { %v670_v36 = vmul.f32 %v668_v35, %v664_v34 }
 0xa1f   :  { %672 = vrot.lane.b32.xlu1 %v670_v36, %s2893_s22 }
 0xa91   :  { %v673_v38 = vpop.permute.xlu1 %672 }
 0xa92   :  { %v675_v39 = vadd.f32 %v673_v38, %v665_v37 }
 0xa94   :  { %2663 = vtanh.f32 %v675_v39 }
 0xa9e   :  { %v2664_v40 = vpop.eup %2663 }
 0xa9f   :  { %678 = vrot.lane.b32.xlu0 %v2664_v40, %s2892_s3 }
 0xb11   :  { %v679_v41 = vpop.permute.xlu0 %678 }
 0xb12   :  { %v681_v42 = vmul.f32 %v679_v41, %v664_v34 }
 0xb14   :  { %683 = vrot.lane.b32.xlu1 %v681_v42, %s2893_s22 }
 0xb86   :  { %v684_v43 = vpop.permute.xlu1 %683 }
 0xb87   :  { %687 = vst.msk [vmem:[#allocation3 + $0x18] sm:$0xff] %vm143_vm1, %v684_v43  ;;  %2363 = vmatmul.mubr.msk.f32.vlgmr.msra.gmra.mrb[10].mxu0 %vm143_vm1, %v684_v43 }
 0xb88   :  { %2563 = vmatpush3.bf16.msra.mxu0 %v3059_v9  ;;  %2384 = vmatprep.mubr.msk.f32.mxu0 %vm2890_vm0, %v2891_v1 }
 0xb89   :  { %2564 = vmatprep.subr.bf16.mxu0 %v2889_v0 }
 0xb8c   :  { %2566 = vmatpush3.bf16.msra.mxu0 %v3063_v14 }
 0xb8d   :  { %2574 = vmatprep.subr.bf16.mxu0 %v2573_v17 }
 0xb8e   :  { %v1108_v29 = vld [vmem:[#allocation3 + $0x18] sm:$0xff] }
 0xc5a   :  { %v758_v45 = vpop.f32.mrb[10].mxu0 }
 0xc5b   :  { %v762_v46 = vadd.f32 %v758_v45, %v255_v44  ;;  %v2364_v47 = vpop.f32.mrb[11].mxu0 }
 0xc5d   :  { %2665 = vtanh.f32 %v762_v46 }
 0xc67   :  { %v2666_v48 = vpop.eup %2665 }
 0xc68   :  { %v764_v49 = vmul.f32 0.5, %v2666_v48 }
 0xc6a   :  { %v765_v50 = vadd.f32 0.5, %v764_v49 }
 0xc6c   :  { %v766_v51 = vsel %vm3087_vm4, %v2666_v48, %v765_v50 }
 0xc6d   :  { %769 = vrot.lane.b32.xlu0 %v766_v51, %s2892_s3  ;;  %v767_v54 = vmul.f32 %v766_v51, %v675_v39 }
 0xcdf   :  { %v770_v52 = vpop.permute.xlu0 %769 }
 0xce0   :  { %v772_v53 = vmul.f32 %v770_v52, %v766_v51  ;;  %v1101_v52 = vld [vmem:[#allocation12 + $0x8] sm:$0xff] }
 0xce2   :  { %774 = vrot.lane.b32.xlu1 %v772_v53, %s2893_s22 }
 0xd54   :  { %v775_v55 = vpop.permute.xlu1 %774 }
 0xd55   :  { %v777_v56 = vadd.f32 %v775_v55, %v767_v54  ;;  %v1102_v54 = vld [vmem:[#allocation12 + $0x10] sm:$0xff]  ;;  %v1103_v55 = vld [vmem:[#allocation12 + $0x18] sm:$0xff] }
 0xd57   :  { %2667 = vtanh.f32 %v777_v56 }
 0xd61   :  { %v2668_v57 = vpop.eup %2667 }
 0xd62   :  { %780 = vrot.lane.b32.xlu0 %v2668_v57, %s2892_s3 }
 0xdd4   :  { %v781_v58 = vpop.permute.xlu0 %780 }
 0xdd5   :  { %v783_v59 = vmul.f32 %v781_v58, %v766_v51  ;;  %v1100_v51 = vld [vmem:[#allocation12] sm:$0xff] }
 0xdd6   :  { %v3218_v53 = vpack.c.bf16 %v1101_v52, %v1100_v51 }
 0xdd7   :  { %785 = vrot.lane.b32.xlu1 %v783_v59, %s2893_s22 }
 0xe49   :  { %v786_v60 = vpop.permute.xlu1 %785 }
 0xe4a   :  { %789 = vst.msk [vmem:[#allocation3 + $0x20] sm:$0xff] %vm143_vm1, %v786_v60  ;;  %2374 = vmatmul.mubr.msk.f32.vlgmr.msra.gmra.mrb[6].mxu1 %vm143_vm1, %v786_v60 }
 0xe4b   :  { %2569 = vmatpush3.bf16.msra.mxu1 %v3059_v9  ;;  %2395 = vmatprep.mubr.msk.f32.mxu1 %vm2890_vm0, %v2891_v1 }
 0xe4c   :  { %2570 = vmatprep.subr.bf16.mxu1 %v2889_v0 }
 0xe4f   :  { %2572 = vmatpush3.bf16.msra.mxu1 %v3063_v14 }
 0xe50   :  { %2581 = vmatprep.subr.bf16.mxu1 %v2889_v0 }
 0xe51   :  { %v1109_v30 = vld [vmem:[#allocation3 + $0x20] sm:$0xff] }
 0xf1d   :  { %v860_v62 = vpop.f32.mrb[6].mxu1 }
 0xf1e   :  { %v864_v2 = vadd.f32 %v860_v62, %v260_v61  ;;  %v2375_v5 = vpop.f32.mrb[7].mxu1  ;;  %v270_v61 = vadd.f32 %v3124_v3, %v3084_v16 }
 0xf20   :  { %2669 = vtanh.f32 %v864_v2 }
 0xf2a   :  { %v2670_v6 = vpop.eup %2669 }
 0xf2b   :  { %v866_v7 = vmul.f32 0.5, %v2670_v6 }
 0xf2d   :  { %v867_v8 = vadd.f32 0.5, %v866_v7 }
 0xf2f   :  { %v868_v9 = vsel %vm3087_vm4, %v2670_v6, %v867_v8  ;;  %v3248_v6 = vld [vmem:[%s3389_s6] ss:$0 sm:$0xff] }
 0xf30   :  { %871 = vrot.lane.b32.xlu0 %v868_v9, %s2892_s3  ;;  %v869_v14 = vmul.f32 %v868_v9, %v777_v56  ;;  %v3222_v56 = vpack.c.bf16 %v1103_v55, %v1102_v54 }
 0xfa2   :  { %v872_v10 = vpop.permute.xlu0 %871 }
 0xfa3   :  { %v874_v11 = vmul.f32 %v872_v10, %v868_v9 }
 0xfa5   :  { %876 = vrot.lane.b32.xlu1 %v874_v11, %s2893_s22 }
0x1017   :  { %v877_v12 = vpop.permute.xlu1 %876 }
0x1018   :  { %v879_v13 = vadd.f32 %v877_v12, %v869_v14 }
0x101a   :  { %2671 = vtanh.f32 %v879_v13 }
0x1024   :  { %v2672_v18 = vpop.eup %2671 }
0x1025   :  { %882 = vrot.lane.b32.xlu0 %v2672_v18, %s2892_s3 }
0x1097   :  { %v883_v19 = vpop.permute.xlu0 %882 }
0x1098   :  { %v885_v20 = vmul.f32 %v883_v19, %v868_v9 }
0x109a   :  { %887 = vrot.lane.b32.xlu1 %v885_v20, %s2893_s22 }
0x110c   :  { %v888_v24 = vpop.permute.xlu1 %887 }
0x110d   :  { %891 = vst.msk [vmem:[#allocation3 + $0x28] sm:$0xff] %vm143_vm1, %v888_v24  ;;  %2385 = vmatmul.mubr.msk.f32.vlgmr.msra.gmra.mrb[12].mxu0 %vm143_vm1, %v888_v24 }
0x110e   :  { %2576 = vmatpush3.bf16.msra.mxu0 %v2573_v17  ;;  %2406 = vmatprep.mubr.msk.f32.mxu0 %vm143_vm1, %v1105_v25 }
0x110f   :  { %2578 = vmatprep.subr.bf16.mxu0 %v2577_v23 }
0x1112   :  { %2580 = vmatpush3.bf16.msra.mxu0 %v2577_v23 }
0x1113   :  { %2593 = vmatprep.subr.bf16.mxu0 %v2889_v0 }
0x1114   :  { %v1110_v31 = vld [vmem:[#allocation3 + $0x28] sm:$0xff] }
0x1115   :  { %2407 = vmatmul.mubr.msk.f32.vlgmr.msra.gmra.mrb[14].mxu0 %vm143_vm1, %v1106_v26 }
0x1116   :  { %2409 = vmatprep.mubr.msk.f32.mxu0 %vm143_vm1, %v1107_v28  ;;  %2595 = vmatpush3.bf16.msra.mxu0 %v3218_v53 }
0x1117   :  { %2596 = vmatprep.subr.bf16.mxu0 %v2889_v0 }
0x1119   :  { %2410 = vmatmul.mubr.msk.f32.gmra.mrb[16].mxu0 %vm143_vm1, %v1108_v29 }
0x111a   :  { %2412 = vmatprep.mubr.msk.f32.mxu0 %vm143_vm1, %v1109_v30  ;;  %2598 = vmatpush3.bf16.msra.mxu0 %v3222_v56 }
0x111b   :  { %2605 = vmatprep.subr.bf16.mxu0 %v2889_v0 }
0x111d   :  { %2413 = vmatmul.mubr.msk.f32.gmra.mrb[18].mxu0 %vm143_vm1, %v1110_v31 }
0x11e0   :  { %v962_v33 = vpop.f32.mrb[12].mxu0 }
0x11e1   :  { %v966_v34 = vadd.f32 %v962_v33, %v265_v32  ;;  %v2386_v35 = vpop.f32.mrb[13].mxu0 }
0x11e3   :  { %2673 = vtanh.f32 %v966_v34 }
0x11e8   :  { %v3200_v36 = vpop.f32.mrb[14].mxu0 }
0x11e9   :  { %v1209_v37 = vpop.f32.mrb[15].mxu0  ;;  %v1215_v35 = vadd.f32 %v3200_v36, %v3248_v6 }
0x11ea   :  { %v1210_v7 = vadd.f32 %v3248_v6, %v1209_v37 }
0x11ec   :  { %v3202_v38 = vpop.f32.mrb[16].mxu0 }
0x11ed   :  { %v2674_v39 = vpop.eup %2673  ;;  %v3204_v40 = vpop.f32.mrb[17].mxu0 }
0x11ee   :  { %v968_v41 = vmul.f32 0.5, %v2674_v39 }
0x11f0   :  { %v3206_v42 = vpop.f32.mrb[18].mxu0  ;;  %v969_v43 = vadd.f32 0.5, %v968_v41 }
0x11f1   :  { %v3208_v44 = vpop.f32.mrb[19].mxu0 }
0x11f2   :  { %v970_v4 = vsel %vm3087_vm4, %v2674_v39, %v969_v43 }
0x11f3   :  { %973 = vrot.lane.b32.xlu0 %v970_v4, %s2892_s3  ;;  %v971_v47 = vmul.f32 %v970_v4, %v879_v13 }
0x1265   :  { %v974_v45 = vpop.permute.xlu0 %973 }
0x1266   :  { %v976_v46 = vmul.f32 %v974_v45, %v970_v4 }
0x1268   :  { %978 = vrot.lane.b32.xlu1 %v976_v46, %s2893_s22 }
0x12da   :  { %v979_v48 = vpop.permute.xlu1 %978 }
0x12db   :  { %v3214_v49 = vadd.f32 %v979_v48, %v971_v47 }
0x12dd   :  { %2675 = vtanh.f32 %v3214_v49 }
0x12e7   :  { %v2676_v50 = vpop.eup %2675 }
0x12e8   :  { %984 = vrot.lane.b32.xlu0 %v2676_v50, %s2892_s3 }
0x135a   :  { %v985_v57 = vpop.permute.xlu0 %984 }
0x135b   :  { %v987_v58 = vmul.f32 %v985_v57, %v970_v4 }
0x135d   :  { %989 = vrot.lane.b32.xlu1 %v987_v58, %s2893_s22 }
0x13cf   :  { %v990_v59 = vpop.permute.xlu1 %989 }
0x13d0   :  { %993 = vst.msk [vmem:[#allocation3 + $0x30] sm:$0xff] %vm143_vm1, %v990_v59  ;;  %2396 = vmatmul.mubr.msk.f32.vlgmr.msra.gmra.mrb[8].mxu1 %vm143_vm1, %v990_v59 }
0x13d1   :  { %2583 = vmatpush3.bf16.msra.mxu1 %v3218_v53  ;;  %2426 = vmatprep.mubr.msk.f32.mxu1 %vm2890_vm0, %v2891_v1 }
0x13d2   :  { %2584 = vmatprep.subr.bf16.mxu1 %v2889_v0 }
0x13d5   :  { %2586 = vmatpush3.bf16.msra.mxu1 %v3222_v56 }
0x13d6   :  { %2587 = vmatprep.subr.bf16.mxu1 %v2889_v0 }
0x13d7   :  { %v1111_v60 = vld [vmem:[#allocation3 + $0x30] sm:$0xff] }
0x13d8   :  { %2427 = vmatmul.mubr.f32.vlgmr.msra.gmra.mrb[10].mxu1 %v2891_v1  ;;  %2415 = vmatprep.mubr.msk.f32.mxu0 %vm143_vm1, %v1111_v60 }
0x13d9   :  { %2589 = vmatpush3.bf16.msra.mxu1 %v3218_v53  ;;  %2437 = vmatprep.mubr.msk.f32.mxu1 %vm2890_vm0, %v2891_v1 }
0x13da   :  { %2590 = vmatprep.subr.bf16.mxu1 %v2889_v0 }
0x13dd   :  { %2592 = vmatpush3.bf16.msra.mxu1 %v3222_v56 }
0x13de   :  { %2599 = vmatprep.subr.bf16.mxu1 %v2889_v0 }
0x14a3   :  { %v1064_v62 = vpop.f32.mrb[8].mxu1 }
0x14a4   :  { %v1068_v2 = vadd.f32 %v1064_v62, %v270_v61  ;;  %v2397_v5 = vpop.f32.mrb[9].mxu1  ;;  %v1220_v61 = vadd.f32 %v3248_v6, %v3204_v40 }
0x14ab   :  { %v1323_v8 = vpop.f32.mrb[10].mxu1 }
0x14ac   :  { %v1327_v9 = vadd.f32 %v1323_v8, %v1210_v7  ;;  %v2428_v10 = vpop.f32.mrb[11].mxu1 }
0x14ae   :  { %2677 = vtanh.f32 %v1327_v9 }
0x14af   :  { %2679 = vtanh.f32 %v1068_v2 }
0x14b8   :  { %v2678_v11 = vpop.eup %2677 }
0x14b9   :  { %v1329_v14 = vmul.f32 0.5, %v2678_v11  ;;  %v2680_v18 = vpop.eup %2679 }
0x14ba   :  { %v1070_v19 = vmul.f32 0.5, %v2680_v18 }
0x14bb   :  { %v1330_v12 = vadd.f32 0.5, %v1329_v14 }
0x14bc   :  { %v1071_v21 = vadd.f32 0.5, %v1070_v19 }
0x14bd   :  { %v1331_v16 = vsel %vm3087_vm4, %v2678_v11, %v1330_v12 }
0x14be   :  { %1334 = vrot.lane.b32.xlu0 %v1331_v16, %s2892_s3  ;;  %v1332_v63 = vmul.f32 0.0, %v1331_v16  ;;  %v1072_v22 = vsel %vm3087_vm4, %v2680_v18, %v1071_v21 }
0x14bf   :  { %v1073_v29 = vmul.f32 %v1072_v22, %v3214_v49 }
0x1530   :  { %v1335_v3 = vpop.permute.xlu0 %1334 }
0x1531   :  { %v1337_v13 = vmul.f32 %v1335_v3, %v1331_v16 }
0x1533   :  { %1339 = vrot.lane.b32.xlu1 %v1337_v13, %s2893_s22 }
0x15a5   :  { %v1340_v15 = vpop.permute.xlu1 %1339 }
0x15a6   :  { %v1342_v17 = vadd.f32 %v1340_v15, %v1332_v63 }
0x15a8   :  { %2681 = vtanh.f32 %v1342_v17 }
0x15b2   :  { %v2682_v20 = vpop.eup %2681 }
0x15b3   :  { %1345 = vrot.lane.b32.xlu0 %v2682_v20, %s2892_s3 }
0x15b7   :  { %1075 = vrot.lane.b32.xlu0 %v1072_v22, %s2892_s3 }
0x1625   :  { %v1346_v23 = vpop.permute.xlu0 %1345 }
0x1626   :  { %v1348_v24 = vmul.f32 %v1346_v23, %v1331_v16 }
0x1628   :  { %1351 = vrot.lane.b32.xlu1 %v1348_v24, %s2893_s22 }
0x1629   :  { %v1076_v25 = vpop.permute.xlu0 %1075 }
0x162a   :  { %v1078_v26 = vmul.f32 %v1076_v25, %v1072_v22 }
0x162c   :  { %1080 = vrot.lane.b32.xlu0 %v1078_v26, %s2893_s22 }
0x169a   :  { %v1352_v28 = vpop.permute.xlu1 %1351 }
0x169b   :  { %2438 = vmatmul.mubr.msk.f32.vlgmr.msra.gmra.mrb[12].mxu1 %vm143_vm1, %v1352_v28 }
0x169c   :  { %2601 = vmatpush3.bf16.msra.mxu1 %v3218_v53  ;;  %2459 = vmatprep.mubr.msk.f32.mxu1 %vm2890_vm0, %v2891_v1 }
0x169d   :  { %2602 = vmatprep.subr.bf16.mxu1 %v2889_v0 }
0x169e   :  { %v1081_v30 = vpop.permute.xlu0 %1080 }
0x169f   :  { %v1083_v31 = vadd.f32 %v1081_v30, %v1073_v29 }
0x16a0   :  { %2604 = vmatpush3.bf16.msra.mxu1 %v3222_v56 }
0x16a1   :  { %2683 = vtanh.f32 %v1083_v31  ;;  %2611 = vmatprep.subr.bf16.mxu1 %v2889_v0 }
0x16ab   :  { %v2684_v32 = vpop.eup %2683 }
0x16ac   :  { %1086 = vrot.lane.b32.xlu0 %v2684_v32, %s2892_s3 }
0x171e   :  { %v1087_v33 = vpop.permute.xlu0 %1086 }
0x171f   :  { %v1089_v34 = vmul.f32 %v1087_v33, %v1072_v22 }
0x1721   :  { %1091 = vrot.lane.b32.xlu0 %v1089_v34, %s2893_s22  ;;  %v1230_v34 = vadd.f32 %v3248_v6, %v3208_v44 }
0x176e   :  { %v1421_v37 = vpop.f32.mrb[12].mxu1 }
0x176f   :  { %v1425_v39 = vadd.f32 %v1421_v37, %v1215_v35  ;;  %v2439_v41 = vpop.f32.mrb[13].mxu1 }
0x1771   :  { %2685 = vtanh.f32 %v1425_v39 }
0x177b   :  { %v2686_v43 = vpop.eup %2685 }
0x177c   :  { %v1427_v4 = vmul.f32 0.5, %v2686_v43 }
0x177e   :  { %v1428_v45 = vadd.f32 0.5, %v1427_v4 }
0x1780   :  { %v1429_v46 = vsel %vm3087_vm4, %v2686_v43, %v1428_v45 }
0x1781   :  { %1432 = vrot.lane.b32.xlu1 %v1429_v46, %s2892_s3  ;;  %v1430_v50 = vmul.f32 %v1429_v46, %v1342_v17  ;;  %v1225_v17 = vadd.f32 %v3202_v38, %v3248_v6 }
0x1793   :  { %v1092_v47 = vpop.permute.xlu0 %1091 }
0x1794   :  { %1095 = vst.msk [vmem:[#allocation3 + $0x38] sm:$0xff] %vm143_vm1, %v1092_v47 }
0x179b   :  { %v1112_v48 = vld [vmem:[#allocation3 + $0x38] sm:$0xff] }
0x179c   :  { %2416 = vmatmul.mubr.msk.f32.gmra.mrb[20].mxu0 %vm143_vm1, %v1112_v48 }
0x179d   :  { %2448 = vmatprep.mubr.msk.f32.mxu0 %vm2890_vm0, %v2891_v1 }
0x17f3   :  { %v1433_v36 = vpop.permute.xlu1 %1432 }
0x17f4   :  { %v1435_v49 = vmul.f32 %v1433_v36, %v1429_v46 }
0x17f6   :  { %1437 = vrot.lane.b32.xlu1 %v1435_v49, %s2893_s22 }
0x1868   :  { %v1438_v51 = vpop.permute.xlu1 %1437 }
0x1869   :  { %v1440_v52 = vadd.f32 %v1438_v51, %v1430_v50 }
0x186b   :  { %2687 = vtanh.f32 %v1440_v52 }
0x186f   :  { %v3281_v54 = vpop.f32.mrb[20].mxu0 }
0x1870   :  { %v3283_v55 = vpop.f32.mrb[21].mxu0 }
0x1875   :  { %v2688_v57 = vpop.eup %2687 }
0x1876   :  { %1443 = vrot.lane.b32.xlu1 %v2688_v57, %s2892_s3  ;;  %v1235_v57 = vadd.f32 %v3206_v42, %v3248_v6 }
0x18e8   :  { %v1444_v58 = vpop.permute.xlu1 %1443 }
0x18e9   :  { %v1446_v59 = vmul.f32 %v1444_v58, %v1429_v46 }
0x18eb   :  { %1449 = vrot.lane.b32.xlu1 %v1446_v59, %s2893_s22 }
0x195d   :  { %v1450_v60 = vpop.permute.xlu1 %1449 }
0x195e   :  { %2449 = vmatmul.mubr.msk.f32.vlgmr.msra.gmra.mrb[22].mxu0 %vm143_vm1, %v1450_v60 }
0x195f   :  { %2607 = vmatpush3.bf16.msra.mxu0 %v3218_v53  ;;  %2470 = vmatprep.mubr.msk.f32.mxu0 %vm2890_vm0, %v2891_v1 }
0x1960   :  { %2608 = vmatprep.subr.bf16.mxu0 %v2889_v0 }
0x1963   :  { %2610 = vmatpush3.bf16.msra.mxu0 %v3222_v56 }
0x1964   :  { %2617 = vmatprep.subr.bf16.mxu0 %v2889_v0 }
0x1a31   :  { %v1519_v62 = vpop.f32.mrb[22].mxu0 }
0x1a32   :  { %v1523_v2 = vadd.f32 %v1519_v62, %v1220_v61  ;;  %v2450_v5 = vpop.f32.mrb[23].mxu0 }
0x1a34   :  { %2689 = vtanh.f32 %v1523_v2 }
0x1a3e   :  { %v2690_v7 = vpop.eup %2689 }
0x1a3f   :  { %v1525_v8 = vmul.f32 0.5, %v2690_v7 }
0x1a41   :  { %v1526_v9 = vadd.f32 0.5, %v1525_v8 }
0x1a43   :  { %v1527_v10 = vsel %vm3087_vm4, %v2690_v7, %v1526_v9 }
0x1a44   :  { %1530 = vrot.lane.b32.xlu0 %v1527_v10, %s2892_s3  ;;  %v1528_v12 = vmul.f32 %v1527_v10, %v1440_v52 }
0x1ab6   :  { %v1531_v11 = vpop.permute.xlu0 %1530 }
0x1ab7   :  { %v1533_v14 = vmul.f32 %v1531_v11, %v1527_v10 }
0x1ab9   :  { %1535 = vrot.lane.b32.xlu1 %v1533_v14, %s2893_s22 }
0x1b2b   :  { %v1536_v16 = vpop.permute.xlu1 %1535 }
0x1b2c   :  { %v1538_v3 = vadd.f32 %v1536_v16, %v1528_v12  ;;  %v1240_v12 = vadd.f32 %v3248_v6, %v3283_v55 }
0x1b2e   :  { %2691 = vtanh.f32 %v1538_v3 }
0x1b38   :  { %v2692_v40 = vpop.eup %2691 }
0x1b39   :  { %1541 = vrot.lane.b32.xlu0 %v2692_v40, %s2892_s3 }
0x1bab   :  { %v1542_v13 = vpop.permute.xlu0 %1541 }
0x1bac   :  { %v1544_v63 = vmul.f32 %v1542_v13, %v1527_v10 }
0x1bae   :  { %1547 = vrot.lane.b32.xlu1 %v1544_v63, %s2893_s22 }
0x1c20   :  { %v1548_v15 = vpop.permute.xlu1 %1547 }
0x1c21   :  { %2460 = vmatmul.mubr.msk.f32.vlgmr.msra.gmra.mrb[14].mxu1 %vm143_vm1, %v1548_v15 }
0x1c22   :  { %2613 = vmatpush3.bf16.msra.mxu1 %v3218_v53  ;;  %2481 = vmatprep.mubr.msk.f32.mxu1 %vm2890_vm0, %v2891_v1 }
0x1c23   :  { %2614 = vmatprep.subr.bf16.mxu1 %v2889_v0 }
0x1c26   :  { %2616 = vmatpush3.bf16.msra.mxu1 %v3222_v56 }
0x1c27   :  { %2623 = vmatprep.subr.bf16.mxu1 %v2889_v0 }
0x1cf4   :  { %v1617_v18 = vpop.f32.mrb[14].mxu1 }
0x1cf5   :  { %v1621_v19 = vadd.f32 %v1617_v18, %v1225_v17  ;;  %v2461_v20 = vpop.f32.mrb[15].mxu1 }
0x1cf7   :  { %2693 = vtanh.f32 %v1621_v19 }
0x1d01   :  { %v2694_v21 = vpop.eup %2693 }
0x1d02   :  { %v1623_v22 = vmul.f32 0.5, %v2694_v21 }
0x1d04   :  { %v1624_v23 = vadd.f32 0.5, %v1623_v22 }
0x1d06   :  { %v1625_v24 = vsel %vm3087_vm4, %v2694_v21, %v1624_v23 }
0x1d07   :  { %1628 = vrot.lane.b32.xlu0 %v1625_v24, %s2892_s3  ;;  %v1626_v28 = vmul.f32 %v1625_v24, %v1538_v3 }
0x1d79   :  { %v1629_v25 = vpop.permute.xlu0 %1628 }
0x1d7a   :  { %v1631_v26 = vmul.f32 %v1629_v25, %v1625_v24  ;;  %v1245_v25 = vadd.f32 %v3281_v54, %v3248_v6  ;;  %v2035_v6 = vld [vmem:[#allocation13] sm:$0xff]  ;;  %v2036_v54 = vld [vmem:[#allocation13 + $0x8] sm:$0xff] }
0x1d7c   :  { %1633 = vrot.lane.b32.xlu1 %v1631_v26, %s2893_s22 }
0x1dee   :  { %v1634_v29 = vpop.permute.xlu1 %1633 }
0x1def   :  { %v1636_v30 = vadd.f32 %v1634_v29, %v1626_v28 }
0x1df1   :  { %2695 = vtanh.f32 %v1636_v30 }
0x1dfb   :  { %v2696_v38 = vpop.eup %2695 }
0x1dfc   :  { %1639 = vrot.lane.b32.xlu0 %v2696_v38, %s2892_s3 }
0x1e6e   :  { %v1640_v31 = vpop.permute.xlu0 %1639 }
0x1e6f   :  { %v1642_v32 = vmul.f32 %v1640_v31, %v1625_v24 }
0x1e71   :  { %1645 = vrot.lane.b32.xlu1 %v1642_v32, %s2893_s22 }
0x1ee3   :  { %v1646_v33 = vpop.permute.xlu1 %1645 }
0x1ee4   :  { %2471 = vmatmul.mubr.msk.f32.vlgmr.msra.gmra.mrb[24].mxu0 %vm143_vm1, %v1646_v33 }
0x1ee5   :  { %2619 = vmatpush3.bf16.msra.mxu0 %v3218_v53  ;;  %2492 = vmatprep.mubr.msk.f32.mxu0 %vm2890_vm0, %v2891_v1 }
0x1ee6   :  { %2620 = vmatprep.subr.bf16.mxu0 %v2889_v0 }
0x1ee9   :  { %2622 = vmatpush3.bf16.msra.mxu0 %v3222_v56 }
0x1eea   :  { %2629 = vmatprep.subr.bf16.mxu0 %v2889_v0 }
0x1fb7   :  { %v1715_v35 = vpop.f32.mrb[24].mxu0 }
0x1fb8   :  { %v1719_v37 = vadd.f32 %v1715_v35, %v1230_v34  ;;  %v2472_v39 = vpop.f32.mrb[25].mxu0 }
0x1fba   :  { %2697 = vtanh.f32 %v1719_v37 }
0x1fc4   :  { %v2698_v41 = vpop.eup %2697 }
0x1fc5   :  { %v1721_v43 = vmul.f32 0.5, %v2698_v41 }
0x1fc7   :  { %v1722_v4 = vadd.f32 0.5, %v1721_v43  ;;  %v2630_v43 = vpack.c.bf16 %v2036_v54, %v2035_v6 }
0x1fc9   :  { %v1723_v45 = vsel %vm3087_vm4, %v2698_v41, %v1722_v4  ;;  %v2037_v41 = vld [vmem:[#allocation13 + $0x10] sm:$0xff]  ;;  %v2038_v4 = vld [vmem:[#allocation13 + $0x18] sm:$0xff] }
0x1fca   :  { %1726 = vrot.lane.b32.xlu0 %v1723_v45, %s2892_s3  ;;  %v1724_v48 = vmul.f32 %v1723_v45, %v1636_v30 }
0x203c   :  { %v1727_v46 = vpop.permute.xlu0 %1726 }
0x203d   :  { %v1729_v47 = vmul.f32 %v1727_v46, %v1723_v45 }
0x203f   :  { %1731 = vrot.lane.b32.xlu1 %v1729_v47, %s2893_s22 }
0x20b1   :  { %v1732_v36 = vpop.permute.xlu1 %1731 }
0x20b2   :  { %v1734_v49 = vadd.f32 %v1732_v36, %v1724_v48  ;;  %v2178_v36 = vld [vmem:[%s3391_s8] ss:$0 sm:$0xff] }
0x20b4   :  { %2699 = vtanh.f32 %v1734_v49 }
0x20be   :  { %v2700_v44 = vpop.eup %2699 }
0x20bf   :  { %1737 = vrot.lane.b32.xlu0 %v2700_v44, %s2892_s3 }
0x2131   :  { %v1738_v50 = vpop.permute.xlu0 %1737 }
0x2132   :  { %v1740_v51 = vmul.f32 %v1738_v50, %v1723_v45  ;;  %v2633_v45 = vpack.c.bf16 %v2038_v4, %v2037_v41 }
0x2134   :  { %1743 = vrot.lane.b32.xlu1 %v1740_v51, %s2893_s22 }
0x21a6   :  { %v1744_v52 = vpop.permute.xlu1 %1743 }
0x21a7   :  { %2482 = vmatmul.mubr.msk.f32.vlgmr.msra.gmra.mrb[16].mxu1 %vm143_vm1, %v1744_v52 }
0x21a8   :  { %2625 = vmatpush3.bf16.msra.mxu1 %v3218_v53  ;;  %2503 = vmatprep.mubr.msk.f32.mxu1 %vm2890_vm0, %v2891_v1 }
0x21a9   :  { %2626 = vmatprep.subr.bf16.mxu1 %v2889_v0 }
0x21ac   :  { %2628 = vmatpush3.bf16.msra.mxu1 %v3222_v56 }
0x227a   :  { %v1813_v58 = vpop.f32.mrb[16].mxu1 }
0x227b   :  { %v1817_v59 = vadd.f32 %v1813_v58, %v1235_v57  ;;  %v2483_v60 = vpop.f32.mrb[17].mxu1 }
0x227d   :  { %2701 = vtanh.f32 %v1817_v59 }
0x2287   :  { %v2702_v61 = vpop.eup %2701 }
0x2288   :  { %v1819_v62 = vmul.f32 0.5, %v2702_v61 }
0x228a   :  { %v1820_v2 = vadd.f32 0.5, %v1819_v62 }
0x228c   :  { %v1821_v53 = vsel %vm3087_vm4, %v2702_v61, %v1820_v2 }
0x228d   :  { %1824 = vrot.lane.b32.xlu0 %v1821_v53, %s2892_s3  ;;  %v1822_v56 = vmul.f32 %v1821_v53, %v1734_v49 }
0x22ff   :  { %v1825_v5 = vpop.permute.xlu0 %1824 }
0x2300   :  { %v1827_v7 = vmul.f32 %v1825_v5, %v1821_v53 }
0x2302   :  { %1829 = vrot.lane.b32.xlu1 %v1827_v7, %s2893_s22 }
0x2374   :  { %v1830_v8 = vpop.permute.xlu1 %1829 }
0x2375   :  { %v1832_v9 = vadd.f32 %v1830_v8, %v1822_v56 }
0x2377   :  { %2703 = vtanh.f32 %v1832_v9 }
0x2381   :  { %v2704_v42 = vpop.eup %2703 }
0x2382   :  { %1835 = vrot.lane.b32.xlu0 %v2704_v42, %s2892_s3 }
0x23f4   :  { %v1836_v10 = vpop.permute.xlu0 %1835 }
0x23f5   :  { %v1838_v11 = vmul.f32 %v1836_v10, %v1821_v53 }
0x23f7   :  { %1841 = vrot.lane.b32.xlu1 %v1838_v11, %s2893_s22 }
0x2469   :  { %v1842_v14 = vpop.permute.xlu1 %1841 }
0x246a   :  { %2493 = vmatmul.mubr.msk.f32.vlgmr.msra.gmra.mrb[26].mxu0 %vm143_vm1, %v1842_v14 }
0x246b   :  { %2514 = vmatprep.mubr.msk.f32.mxu0 %vm2890_vm0, %v2891_v1  ;;  %2631 = vmatpush3.bf16.msra.mxu0 %v2630_v43 }
0x246c   :  { %2632 = vmatprep.subr.bf16.mxu0 %v2889_v0 }
0x246f   :  { %2634 = vmatpush3.bf16.msra.mxu0 %v2633_v45 }
0x253d   :  { %v1911_v16 = vpop.f32.mrb[26].mxu0 }
0x253e   :  { %v1915_v3 = vadd.f32 %v1911_v16, %v1240_v12  ;;  %v2494_v40 = vpop.f32.mrb[27].mxu0 }
0x2540   :  { %2705 = vtanh.f32 %v1915_v3 }
0x254a   :  { %v2706_v13 = vpop.eup %2705 }
0x254b   :  { %v1917_v63 = vmul.f32 0.5, %v2706_v13 }
0x254d   :  { %v1918_v15 = vadd.f32 0.5, %v1917_v63 }
0x254f   :  { %v1919_v17 = vsel %vm3087_vm4, %v2706_v13, %v1918_v15 }
0x2550   :  { %1922 = vrot.lane.b32.xlu0 %v1919_v17, %s2892_s3  ;;  %v1920_v1 = vmul.f32 %v1919_v17, %v1832_v9 }
0x25c2   :  { %v1923_v18 = vpop.permute.xlu0 %1922 }
0x25c3   :  { %v1925_v19 = vmul.f32 %v1923_v18, %v1919_v17 }
0x25c5   :  { %1927 = vrot.lane.b32.xlu1 %v1925_v19, %s2893_s22 }
0x2637   :  { %v1928_v20 = vpop.permute.xlu1 %1927 }
0x2638   :  { %v1930_v21 = vadd.f32 %v1928_v20, %v1920_v1 }
0x263a   :  { %2707 = vtanh.f32 %v1930_v21 }
0x2644   :  { %v2708_v55 = vpop.eup %2707 }
0x2645   :  { %1933 = vrot.lane.b32.xlu0 %v2708_v55, %s2892_s3 }
0x26b7   :  { %v1934_v22 = vpop.permute.xlu0 %1933 }
0x26b8   :  { %v1936_v23 = vmul.f32 %v1934_v22, %v1919_v17 }
0x26ba   :  { %1939 = vrot.lane.b32.xlu1 %v1936_v23, %s2893_s22 }
0x272c   :  { %v1940_v24 = vpop.permute.xlu1 %1939 }
0x272d   :  { %2504 = vmatmul.mubr.msk.f32.vlgmr.msra.gmra.mrb[18].mxu1 %vm143_vm1, %v1940_v24 }
0x2800   :  { %v2009_v26 = vpop.f32.mrb[18].mxu1 }
0x2801   :  { %v2013_v28 = vadd.f32 %v2009_v26, %v1245_v25  ;;  %v2505_v29 = vpop.f32.mrb[19].mxu1 }
0x2803   :  { %2709 = vtanh.f32 %v2013_v28 }
0x280d   :  { %v2710_v30 = vpop.eup %2709 }
0x280e   :  { %v2015_v38 = vmul.f32 0.5, %v2710_v30 }
0x2810   :  { %v2016_v31 = vadd.f32 0.5, %v2015_v38 }
0x2812   :  { %v2017_v32 = vsel %vm3087_vm4, %v2710_v30, %v2016_v31 }
0x2813   :  { %2020 = vrot.lane.b32.xlu0 %v2017_v32, %s2892_s3  ;;  %v2018_v35 = vmul.f32 %v2017_v32, %v1930_v21 }
0x2885   :  { %v2021_v33 = vpop.permute.xlu0 %2020 }
0x2886   :  { %v2023_v34 = vmul.f32 %v2021_v33, %v2017_v32 }
0x2888   :  { %2025 = vrot.lane.b32.xlu1 %v2023_v34, %s2893_s22 }
0x28fa   :  { %v2026_v37 = vpop.permute.xlu1 %2025 }
0x28fb   :  { %v2028_v39 = vadd.f32 %v2026_v37, %v2018_v35 }
0x28fd   :  { %2711 = vtanh.f32 %v2028_v39 }
0x2907   :  { %v2712_v27 = vpop.eup %2711 }
0x2908   :  { %2031 = vrot.lane.b32.xlu0 %v2712_v27, %s2892_s3 }
0x297a   :  { %v2032_v46 = vpop.permute.xlu0 %2031 }
0x297b   :  { %v2034_v47 = vmul.f32 %v2032_v46, %v2017_v32 }
0x297d   :  { %2047 = vrot.lane.b32.xlu1 %v2034_v47, %s2893_s22 }
0x29ef   :  { %v2048_v48 = vpop.permute.xlu1 %2047 }
0x29f0   :  { %2515 = vmatmul.mubr.msk.f32.vlgmr.msra.gmra.mrb[28].mxu0 %vm143_vm1, %v2048_v48 }
0x2ac3   :  { %v2117_v49 = vpop.f32.mrb[28].mxu0 }
0x2ac4   :  { %v2118_v44 = vadd.f32 %v2178_v36, %v2117_v49  ;;  %v2516_v50 = vpop.f32.mrb[29].mxu0 }
0x2ac6   :  { %v2180_v51 = vmul.f32 -1.442695, %v2118_v44 }
0x2ac8   :  { %2713 = vpow2.f32 %v2180_v51 }
0x2ad2   :  { %v2714_v0 = vpop.eup %2713 }
0x2ad3   :  { %v2124_v52 = vadd.f32 1.0, %v2714_v0 }
0x2ad5   :  { %2715 = vrcp.f32 %v2124_v52 }
0x2adf   :  { %v2716_v57 = vpop.eup %2715 }
0x2ae0   :  { %2127 = vst [vmem:[#allocation15] sm:$0xff] %v2716_v57 }
0x2ae1   :  { %2860 = shalt.err (!%p2857_p10)
}
0x2ae2   :  { %s2861_s26 = scalar_lea.hbm %s3392_s9, 128 }
0x2ae3   :  { %p2862_p11 = scmp.ne.s32.totalorder %s3392_s9, %s2861_s26  ;;  %p2865_p12 = scmp.lt.u32.totalorder %s2861_s26, %s3392_s9 }
0x2ae5   :  { %p2867_p13 = pnand %p2865_p12, %p2862_p11 }
0x2ae7   :  { %2870 = shalt.err (!%p2867_p13)
}
0x2ae8   :  { %2137 = dma.vmem_to_hbm [thread:$0]  %s2135_s23, 128, %s3392_s9, [#allocation6]  }
0x2ae9   :  { %2879 = dma.done.wait [#allocation6], 128  }
0x2aea   :  { %2880 = vsyncadd [#allocation6], 4294967168 }
0x2aeb   :  { %2141 = vsyncpa [#allocation5], 1 }
0x2aec   :  { %2142 = vsyncpa [#allocation8], 1 }
0x2aed   :  { %2143 = vsyncpa [#allocation11], 1 }
0x2aee   :  { %2144 = vsyncpa [#allocation14], 1 }
0x2aef   :  { %2145 = vsyncpa [#allocation6], 1 }

</bundles_post_ra>
